<compile_context>
chip_gen: v5e
topology: v5e:2x2
jax: 0.10.0
libtpu: 0.0.40
codegen_flags: <defaults>
</compile_context>

<pallas_src>
import functools

import jax
import jax.numpy as jnp
import numpy as np
from jax.experimental import pallas as pl
from jax.experimental.pallas import tpu as pltpu


def _softmax_lastdim(s):
    m = jnp.max(s, axis=-1, keepdims=True)
    e = jnp.exp(s - m)
    return e * pl.reciprocal(jnp.sum(e, axis=-1, keepdims=True), approx=True)


def _attention_kernel(num_heads, d_k, mm_dtype,
                      x_ref, mq_ref, mk_ref, rc_ref,
                      wqkv_ref, bqkv_ref, w1_ref, b1_ref, w2t_ref, b2_ref,
                      wo_ref, bo_ref, gamma_ref, beta_ref, o_ref):
    TB, L, h = x_ref.shape
    H = num_heads
    f32 = jnp.float32
    neg_inf = f32(-jnp.inf)

    def mm(a, b, dn=None):
        # MXU matmul; operands narrowed to mm_dtype (no-op casts if already
        # cast wrapper-side), accumulation always f32.
        a = a.astype(mm_dtype)
        b = b.astype(mm_dtype)
        if dn is None:
            return jnp.dot(a, b, preferred_element_type=f32)
        return jax.lax.dot_general(a, b, dn, preferred_element_type=f32)

    x3 = x_ref[...]                                       # (TB, L, h)
    x2 = x3.reshape(TB * L, h)                             # leading merge: free

    # ---- pair mask built in-kernel from the 1-D mask (exact 0/1 floats) ----
    mq = mq_ref[...]                                       # (TB, L, 1)
    mk = mk_ref[...]                                       # (TB, 1, L)
    pairf = mq * mk                                        # (TB, L, L)
    valid = (pairf > 0.5)[None]                            # (1, TB, L, L)
    row_zero = (jnp.max(pairf, axis=-1, keepdims=True) <= 0.5)[None]  # (1,TB,L,1)

    # ---- fused QKV projection: one MXU push over TB*L rows -----------------
    qkv = mm(x2, wqkv_ref[...]) + bqkv_ref[...]            # (TB*L, 3h)

    def heads(t2):
        # (TB*L, h) -> (H*TB, L, d_k). Static lane slices + stack (proven
        # lowering); the surrounding reshapes only touch leading dims.
        t3 = t2.reshape(TB, L, h)
        th = jnp.stack([t3[:, :, i * d_k:(i + 1) * d_k] for i in range(H)],
                       axis=0)                             # (H, TB, L, d_k)
        return th.reshape(H * TB, L, d_k)

    qh = heads(qkv[:, 0:h])
    kh = heads(qkv[:, h:2 * h])
    vh = heads(qkv[:, 2 * h:3 * h])

    # ---- attention scores (batched over H*TB) + masking + softmax ----------
    scale = f32(1.0 / (d_k ** 0.5))
    s = mm(qh, kh, (((2,), (2,)), ((0,), (0,)))) * scale   # (H*TB, L, L)
    s = s.reshape(H, TB, L, L)
    s = jnp.where(valid, s, neg_inf)
    s = jnp.where(row_zero, 0.0, s)
    attn_w = _softmax_lastdim(s)

    # ---- repr MLP: layer 1 on the MXU over all TB*L*L pair rows ------------
    rc2 = rc_ref[...].reshape(TB * L * L, rc_ref.shape[-1])
    h1 = jnp.maximum(mm(rc2, w1_ref[...]) + b1_ref[...], 0.0)   # (TB*L*L, 32)
    h1_4d = h1.reshape(TB, L, L, h1.shape[-1])
    w2t = w2t_ref[...]                                     # (H, 32)
    # Layer 2: per-head broadcast-multiply + lane reduce -> lands directly in
    # head-major layout (H, TB, L, L); kept off the MXU intentionally (see
    # header comment).
    r = jnp.stack([jnp.sum(h1_4d * w2t[i], axis=-1) for i in range(H)], axis=0)
    r = r + b2_ref[...]                                    # + (H,1,1,1)
    r = jnp.where(valid, r, neg_inf)
    r = jnp.where(row_zero, 0.0, r)
    ref_w = _softmax_lastdim(r)

    # ---- combine, normalise (exact divide), apply to values ----------------
    comb = attn_w + ref_w
    comb = comb / jnp.sum(comb, axis=-1, keepdims=True)
    ctx = mm(comb.reshape(H * TB, L, L), vh,
             (((2,), (1,)), ((0,), (0,))))                 # (H*TB, L, d_k)
    ctx = ctx.reshape(H, TB, L, d_k)

    # concat heads -> single output projection over TB*L rows
    out_cat = jnp.concatenate([ctx[i] for i in range(H)], axis=-1)  # (TB, L, h)
    out = mm(out_cat.reshape(TB * L, h), wo_ref[...]) + bo_ref[...]  # (TB*L, h)

    # ---- residual + LayerNorm (eps = 1e-5, biased variance) ----------------
    y = x2 + out
    mean = jnp.mean(y, axis=-1, keepdims=True)
    var = jnp.mean((y - mean) ** 2, axis=-1, keepdims=True)
    yn = (y - mean) * jax.lax.rsqrt(var + f32(1e-5))
    yn = yn * gamma_ref[...] + beta_ref[...]
    o_ref[...] = yn.reshape(TB, L, h)


def _pick_batch_tile(B, L, target_rows=256):
    """Largest useful batch tile: TB*L >= target rows, but keep >=2 grid steps
    when possible so v7x's two TensorCores both get work."""
    divisors = [d for d in range(1, B + 1) if B % d == 0]
    allowed = [d for d in divisors if B // d >= 2] or divisors
    for d in allowed:
        if d * L >= target_rows:
            return d
    return allowed[-1]


def attention_block(x, mask, refCov, params, num_heads,
                    matmul_dtype=jnp.float32, batch_tile=None):
    B, L, h = x.shape
    assert h % num_heads == 0, "hidden_dim must be divisible by num_heads"
    d_k = h // num_heads
    repr_in = refCov.shape[-1]
    repr_hidden = params["w1"].shape[1]
    mm_dtype = jnp.dtype(matmul_dtype)

    TB = batch_tile if batch_tile is not None else _pick_batch_tile(B, L)
    assert B % TB == 0, "batch_tile must divide the batch size"

    # Pad the repr input dim (53 -> 64) so the DMA / MXU contraction is
    # lane-aligned; zero padding is exact.
    repr_pad = ((repr_in + 63) // 64) * 64

    # Fused QKV weights / biases (one MXU push instead of three).
    wqkv = jnp.concatenate([params["wq"], params["wk"], params["wv"]], axis=1)
    bqkv = jnp.concatenate([params["bq"], params["bk"], params["bv"]], axis=1)
    w1p = jnp.pad(params["w1"], ((0, repr_pad - repr_in), (0, 0)))
    w2t = params["w2"].T                                 # (H, repr_hidden)
    b2 = params["b2"].reshape(num_heads, 1, 1, 1)
    wo = params["wo"]

    # refCov flattened over the (L, L) pair dims + zero-padded feature dim.
    rc_flat = jnp.pad(refCov.reshape(B, L * L, repr_in).astype(jnp.float32),
                      ((0, 0), (0, 0), (0, repr_pad - repr_in)))

    # Narrow MXU operands ONCE wrapper-side (halves weight / refCov DMA bytes
    # in bf16 mode); biases and all elementwise math stay f32.
    if mm_dtype != jnp.dtype(jnp.float32):
        wqkv = wqkv.astype(mm_dtype)
        w1p = w1p.astype(mm_dtype)
        wo = wo.astype(mm_dtype)
        rc_flat = rc_flat.astype(mm_dtype)

    maskf = mask.astype(jnp.float32)
    mask_q = maskf[:, :, None]                           # (B, L, 1)
    mask_k = maskf[:, None, :]                           # (B, 1, L)

    kernel = functools.partial(_attention_kernel, num_heads, d_k, mm_dtype)

    w2d = lambda b: (0, 0)
    w4d = lambda b: (0, 0, 0, 0)
    grid_spec = pltpu.PrefetchScalarGridSpec(
        num_scalar_prefetch=0,
        grid=(B // TB,),
        in_specs=[
            pl.BlockSpec((TB, L, h), lambda b: (b, 0, 0)),             # x
            pl.BlockSpec((TB, L, 1), lambda b: (b, 0, 0)),             # mask (q side)
            pl.BlockSpec((TB, 1, L), lambda b: (b, 0, 0)),             # mask (k side)
            pl.BlockSpec((TB, L * L, repr_pad), lambda b: (b, 0, 0)),  # refCov
            pl.BlockSpec((h, 3 * h), w2d),                             # wqkv
            pl.BlockSpec((1, 3 * h), w2d),                             # bqkv
            pl.BlockSpec((repr_pad, repr_hidden), w2d),                # w1 (padded)
            pl.BlockSpec((1, repr_hidden), w2d),                       # b1
            pl.BlockSpec((num_heads, repr_hidden), w2d),               # w2 (transposed)
            pl.BlockSpec((num_heads, 1, 1, 1), w4d),                   # b2
            pl.BlockSpec((h, h), w2d),                                 # wo
            pl.BlockSpec((1, h), w2d),                                 # bo
            pl.BlockSpec((1, h), w2d),                                 # gamma
            pl.BlockSpec((1, h), w2d),                                 # beta
        ],
        out_specs=pl.BlockSpec((TB, L, h), lambda b: (b, 0, 0)),
    )

    return pl.pallas_call(
        kernel,
        out_shape=jax.ShapeDtypeStruct((B, L, h), jnp.float32),
        grid_spec=grid_spec,
        compiler_params=pltpu.CompilerParams(
            dimension_semantics=("parallel",),
            vmem_limit_bytes=32 * 1024 * 1024),
    )(x.astype(jnp.float32), mask_q, mask_k, rc_flat,
      wqkv, bqkv, w1p, params["b1"], w2t, b2,
      wo, params["bo"], params["gamma"], params["beta"])


# ----------------------------------------------------------------------------
# Deterministic parameter init (shapes match the PyTorch module __init__).
# ----------------------------------------------------------------------------
def init_params(key, hidden_dim, num_heads, repr_in=53, repr_hidden=32):
    ks = jax.random.split(key, 12)

    def rnd(k, shape, fan_in):
        return (jax.random.normal(k, shape, dtype=jnp.float32)
                / np.float32(np.sqrt(fan_in)))

    return dict(
        wq=rnd(ks[0], (hidden_dim, hidden_dim), hidden_dim),
        bq=rnd(ks[1], (1, hidden_dim), hidden_dim),
        wk=rnd(ks[2], (hidden_dim, hidden_dim), hidden_dim),
        bk=rnd(ks[3], (1, hidden_dim), hidden_dim),
        wv=rnd(ks[4], (hidden_dim, hidden_dim), hidden_dim),
        bv=rnd(ks[5], (1, hidden_dim), hidden_dim),
        wo=rnd(ks[6], (hidden_dim, hidden_dim), hidden_dim),
        bo=rnd(ks[7], (1, hidden_dim), hidden_dim),
        w1=rnd(ks[8], (repr_in, repr_hidden), repr_in),
        b1=rnd(ks[9], (1, repr_hidden), repr_in),
        w2=rnd(ks[10], (repr_hidden, num_heads), repr_hidden),
        b2=rnd(ks[11], (1, num_heads), repr_hidden),
        gamma=jnp.ones((1, hidden_dim), jnp.float32),
        beta=jnp.zeros((1, hidden_dim), jnp.float32),
    )


# ----------------------------------------------------------------------------
# Pure-JAX reference of the PyTorch forward (for validation).
# ----------------------------------------------------------------------------
def ref_forward(x, mask, refCov, p, num_heads):
    B, L, h = x.shape
    d_k = h // num_heads

    def lin(v, w, b):
        return v @ w + b

    q = lin(x, p["wq"], p["bq"])
    k = lin(x, p["wk"], p["bk"])
    v = lin(x, p["wv"], p["bv"])

    def split(t):
        return t.reshape(B, L, num_heads, d_k).transpose(0, 2, 1, 3)

    q, k, v = split(q), split(k), split(v)
    scores = jnp.einsum("bhld,bhmd->bhlm", q, k) / np.float32(np.sqrt(d_k))

    mask2d = mask[:, :, None] & mask[:, None, :]   # (B, L, L)

    def apply_mask(t):
        mm = mask2d[:, None, :, :]
        t = jnp.where(mm, t, -jnp.inf)
        all_inf = jnp.all(t == -jnp.inf, axis=-1, keepdims=True)
        return jnp.where(all_inf, 0.0, t)

    attn_w = jax.nn.softmax(apply_mask(scores), axis=-1)

    r1 = jnp.maximum(refCov @ p["w1"] + p["b1"], 0.0)
    rl = (r1 @ p["w2"] + p["b2"]).transpose(0, 3, 1, 2)     # (B, H, L, L)
    ref_w = jax.nn.softmax(apply_mask(rl), axis=-1)

    comb = attn_w + ref_w
    comb = comb / comb.sum(-1, keepdims=True)

    out = jnp.einsum("bhlm,bhmd->bhld", comb, v)
    out = out.transpose(0, 2, 1, 3).reshape(B, L, h)
    out = lin(out, p["wo"], p["bo"])

    y = x + out
    mean = y.mean(-1, keepdims=True)
    var = ((y - mean) ** 2).mean(-1, keepdims=True)
    return (y - mean) / jnp.sqrt(var + 1e-5) * p["gamma"] + p["beta"]


# ----------------------------------------------------------------------------
if __name__ == "__main__":
    B, L, hidden_dim, num_heads = 2, 8, 32, 4
    repr_in = 53

    key = jax.random.PRNGKey(0)
    kx, kr, kp = jax.random.split(key, 3)
    x = jax.random.normal(kx, (B, L, hidden_dim), dtype=jnp.float32)
    refCov = jax.random.normal(kr, (B, L, L, repr_in), dtype=jnp.float32)
    mask = jnp.array([[1, 1, 1, 1, 1, 1, 1, 1],
                      [1, 1, 1, 1, 1, 0, 0, 0]], dtype=bool)

    params = init_params(kp, hidden_dim, num_heads, repr_in, 32)

    # TODO(synk): the refCov=None / mask=None branches of forward() are not
    # exercised; the kernel assumes both mask and refCov are provided.

    # Exact (f32-MXU) path: checked against the pure-JAX reference.
    out = attention_block(x, mask, refCov, params, num_heads)
    out = jax.block_until_ready(out)
    expected = ref_forward(x, mask, refCov, params, num_heads)
    np.testing.assert_allclose(np.asarray(out), np.asarray(expected),
                               rtol=1e-2, atol=1e-2)

    # bf16-MXU perf mode (v5e/v6e): smoke-test that it compiles and runs;
    # accumulation and all elementwise math remain f32.
    out_bf16 = attention_block(x, mask, refCov, params, num_heads,
                               matmul_dtype=jnp.bfloat16)
    out_bf16 = jax.block_until_ready(out_bf16)
    assert np.isfinite(np.asarray(out_bf16)).all()

    print("KERNEL_OK")
</pallas_src>

<mosaic_0001>
module attributes {stable_mosaic.version = 11 : i64} {
  func.func @_attention_kernel(%arg0: i32, %arg1: memref<1x8x32xf32, #tpu.memory_space<vmem>>, %arg2: memref<1x8x1xf32, #tpu.memory_space<vmem>>, %arg3: memref<1x1x8xf32, #tpu.memory_space<vmem>>, %arg4: memref<1x64x64xf32, #tpu.memory_space<vmem>>, %arg5: memref<32x96xf32, #tpu.memory_space<vmem>>, %arg6: memref<1x96xf32, #tpu.memory_space<vmem>>, %arg7: memref<64x32xf32, #tpu.memory_space<vmem>>, %arg8: memref<1x32xf32, #tpu.memory_space<vmem>>, %arg9: memref<4x32xf32, #tpu.memory_space<vmem>>, %arg10: memref<4x1x1x1xf32, #tpu.memory_space<vmem>>, %arg11: memref<32x32xf32, #tpu.memory_space<vmem>>, %arg12: memref<1x32xf32, #tpu.memory_space<vmem>>, %arg13: memref<1x32xf32, #tpu.memory_space<vmem>>, %arg14: memref<1x32xf32, #tpu.memory_space<vmem>>, %arg15: memref<1x8x32xf32, #tpu.memory_space<vmem>>) attributes {dimension_semantics = [#tpu.dimension_semantics<parallel>], iteration_bounds = array<i64: 2>, scalar_prefetch = 0 : i64, scratch_operands = 0 : i64, tpu.core_type = #tpu.core_type<tc>, window_params = [{transform_indices = @transform_0, window_bounds = array<i64: 1, 8, 32>}, {transform_indices = @transform_1, window_bounds = array<i64: 1, 8, 1>}, {transform_indices = @transform_2, window_bounds = array<i64: 1, 1, 8>}, {transform_indices = @transform_3, window_bounds = array<i64: 1, 64, 64>}, {pipeline_mode = #tpu.pipeline_mode<synchronous>, transform_indices = @transform_4, window_bounds = array<i64: 32, 96>}, {pipeline_mode = #tpu.pipeline_mode<synchronous>, transform_indices = @transform_5, window_bounds = array<i64: 1, 96>}, {pipeline_mode = #tpu.pipeline_mode<synchronous>, transform_indices = @transform_6, window_bounds = array<i64: 64, 32>}, {pipeline_mode = #tpu.pipeline_mode<synchronous>, transform_indices = @transform_7, window_bounds = array<i64: 1, 32>}, {pipeline_mode = #tpu.pipeline_mode<synchronous>, transform_indices = @transform_8, window_bounds = array<i64: 4, 32>}, {pipeline_mode = #tpu.pipeline_mode<synchronous>, transform_indices = @transform_9, window_bounds = array<i64: 4, 1, 1, 1>}, {pipeline_mode = #tpu.pipeline_mode<synchronous>, transform_indices = @transform_10, window_bounds = array<i64: 32, 32>}, {pipeline_mode = #tpu.pipeline_mode<synchronous>, transform_indices = @transform_11, window_bounds = array<i64: 1, 32>}, {pipeline_mode = #tpu.pipeline_mode<synchronous>, transform_indices = @transform_12, window_bounds = array<i64: 1, 32>}, {pipeline_mode = #tpu.pipeline_mode<synchronous>, transform_indices = @transform_13, window_bounds = array<i64: 1, 32>}, {transform_indices = @transform_14, window_bounds = array<i64: 1, 8, 32>}]} {
    %c0 = arith.constant 0 : index
    %c0_0 = arith.constant 0 : index
    %c0_1 = arith.constant 0 : index
    %0 = vector.load %arg1[%c0, %c0_0, %c0_1] : memref<1x8x32xf32, #tpu.memory_space<vmem>>, vector<1x8x32xf32>
    %1 = vector.shape_cast %0 : vector<1x8x32xf32> to vector<8x32xf32>
    %c0_2 = arith.constant 0 : index
    %c0_3 = arith.constant 0 : index
    %c0_4 = arith.constant 0 : index
    %2 = vector.load %arg2[%c0_2, %c0_3, %c0_4] : memref<1x8x1xf32, #tpu.memory_space<vmem>>, vector<1x8x1xf32>
    %c0_5 = arith.constant 0 : index
    %c0_6 = arith.constant 0 : index
    %c0_7 = arith.constant 0 : index
    %3 = vector.load %arg3[%c0_5, %c0_6, %c0_7] : memref<1x1x8xf32, #tpu.memory_space<vmem>>, vector<1x1x8xf32>
    %4 = vector.broadcast %2 : vector<1x8x1xf32> to vector<1x8x8xf32>
    %5 = vector.broadcast %3 : vector<1x1x8xf32> to vector<1x8x8xf32>
    %6 = arith.mulf %4, %5 : vector<1x8x8xf32>
    %cst = arith.constant 5.000000e-01 : f32
    %7 = vector.broadcast %cst : f32 to vector<1x8x8xf32>
    %8 = arith.cmpf ogt, %6, %7 : vector<1x8x8xf32>
    %9 = vector.shape_cast %8 : vector<1x8x8xi1> to vector<1x1x8x8xi1>
    %cst_8 = arith.constant dense<0xFF800000> : vector<1x8xf32>
    %10 = vector.multi_reduction <maximumf>, %6, %cst_8 [2] : vector<1x8x8xf32> to vector<1x8xf32>
    %11 = vector.shape_cast %10 : vector<1x8xf32> to vector<1x8x1xf32>
    %cst_9 = arith.constant 5.000000e-01 : f32
    %12 = vector.broadcast %cst_9 : f32 to vector<1x8x1xf32>
    %13 = arith.cmpf ole, %11, %12 : vector<1x8x1xf32>
    %14 = vector.shape_cast %13 : vector<1x8x1xi1> to vector<1x1x8x1xi1>
    %c0_10 = arith.constant 0 : index
    %c0_11 = arith.constant 0 : index
    %15 = vector.load %arg5[%c0_10, %c0_11] : memref<32x96xf32, #tpu.memory_space<vmem>>, vector<32x96xf32>
    %cst_12 = arith.constant dense<0.000000e+00> : vector<8x96xf32>
    %16 = tpu.matmul %1, %15, %cst_12 {dimension_numbers = #tpu.dot_dimension_numbers<[1], [0], [0], [1], [0, 0, 1, 1], [], []>} : vector<8x32xf32>, vector<32x96xf32>, vector<8x96xf32> -> vector<8x96xf32>
    %c0_13 = arith.constant 0 : index
    %c0_14 = arith.constant 0 : index
    %17 = vector.load %arg6[%c0_13, %c0_14] : memref<1x96xf32, #tpu.memory_space<vmem>>, vector<1x96xf32>
    %18 = vector.broadcast %17 : vector<1x96xf32> to vector<8x96xf32>
    %19 = arith.addf %16, %18 : vector<8x96xf32>
    %20 = vector.extract_strided_slice %19 {offsets = [0, 0], sizes = [8, 32], strides = [1, 1]} : vector<8x96xf32> to vector<8x32xf32>
    %21 = vector.shape_cast %20 : vector<8x32xf32> to vector<1x8x32xf32>
    %22 = vector.extract_strided_slice %21 {offsets = [0, 0, 0], sizes = [1, 8, 8], strides = [1, 1, 1]} : vector<1x8x32xf32> to vector<1x8x8xf32>
    %23 = vector.extract_strided_slice %21 {offsets = [0, 0, 8], sizes = [1, 8, 8], strides = [1, 1, 1]} : vector<1x8x32xf32> to vector<1x8x8xf32>
    %24 = vector.extract_strided_slice %21 {offsets = [0, 0, 16], sizes = [1, 8, 8], strides = [1, 1, 1]} : vector<1x8x32xf32> to vector<1x8x8xf32>
    %25 = vector.extract_strided_slice %21 {offsets = [0, 0, 24], sizes = [1, 8, 8], strides = [1, 1, 1]} : vector<1x8x32xf32> to vector<1x8x8xf32>
    %26 = vector.shape_cast %22 : vector<1x8x8xf32> to vector<1x1x8x8xf32>
    %27 = vector.shape_cast %23 : vector<1x8x8xf32> to vector<1x1x8x8xf32>
    %28 = vector.shape_cast %24 : vector<1x8x8xf32> to vector<1x1x8x8xf32>
    %29 = vector.shape_cast %25 : vector<1x8x8xf32> to vector<1x1x8x8xf32>
    %30 = tpu.concatenate %26, %27, %28, %29 in 0 : vector<1x1x8x8xf32>, vector<1x1x8x8xf32>, vector<1x1x8x8xf32>, vector<1x1x8x8xf32> -> vector<4x1x8x8xf32>
    %31 = vector.shape_cast %30 : vector<4x1x8x8xf32> to vector<4x8x8xf32>
    %32 = vector.extract_strided_slice %19 {offsets = [0, 32], sizes = [8, 32], strides = [1, 1]} : vector<8x96xf32> to vector<8x32xf32>
    %33 = vector.shape_cast %32 : vector<8x32xf32> to vector<1x8x32xf32>
    %34 = vector.extract_strided_slice %33 {offsets = [0, 0, 0], sizes = [1, 8, 8], strides = [1, 1, 1]} : vector<1x8x32xf32> to vector<1x8x8xf32>
    %35 = vector.extract_strided_slice %33 {offsets = [0, 0, 8], sizes = [1, 8, 8], strides = [1, 1, 1]} : vector<1x8x32xf32> to vector<1x8x8xf32>
    %36 = vector.extract_strided_slice %33 {offsets = [0, 0, 16], sizes = [1, 8, 8], strides = [1, 1, 1]} : vector<1x8x32xf32> to vector<1x8x8xf32>
    %37 = vector.extract_strided_slice %33 {offsets = [0, 0, 24], sizes = [1, 8, 8], strides = [1, 1, 1]} : vector<1x8x32xf32> to vector<1x8x8xf32>
    %38 = vector.shape_cast %34 : vector<1x8x8xf32> to vector<1x1x8x8xf32>
    %39 = vector.shape_cast %35 : vector<1x8x8xf32> to vector<1x1x8x8xf32>
    %40 = vector.shape_cast %36 : vector<1x8x8xf32> to vector<1x1x8x8xf32>
    %41 = vector.shape_cast %37 : vector<1x8x8xf32> to vector<1x1x8x8xf32>
    %42 = tpu.concatenate %38, %39, %40, %41 in 0 : vector<1x1x8x8xf32>, vector<1x1x8x8xf32>, vector<1x1x8x8xf32>, vector<1x1x8x8xf32> -> vector<4x1x8x8xf32>
    %43 = vector.shape_cast %42 : vector<4x1x8x8xf32> to vector<4x8x8xf32>
    %44 = vector.extract_strided_slice %19 {offsets = [0, 64], sizes = [8, 32], strides = [1, 1]} : vector<8x96xf32> to vector<8x32xf32>
    %45 = vector.shape_cast %44 : vector<8x32xf32> to vector<1x8x32xf32>
    %46 = vector.extract_strided_slice %45 {offsets = [0, 0, 0], sizes = [1, 8, 8], strides = [1, 1, 1]} : vector<1x8x32xf32> to vector<1x8x8xf32>
    %47 = vector.extract_strided_slice %45 {offsets = [0, 0, 8], sizes = [1, 8, 8], strides = [1, 1, 1]} : vector<1x8x32xf32> to vector<1x8x8xf32>
    %48 = vector.extract_strided_slice %45 {offsets = [0, 0, 16], sizes = [1, 8, 8], strides = [1, 1, 1]} : vector<1x8x32xf32> to vector<1x8x8xf32>
    %49 = vector.extract_strided_slice %45 {offsets = [0, 0, 24], sizes = [1, 8, 8], strides = [1, 1, 1]} : vector<1x8x32xf32> to vector<1x8x8xf32>
    %50 = vector.shape_cast %46 : vector<1x8x8xf32> to vector<1x1x8x8xf32>
    %51 = vector.shape_cast %47 : vector<1x8x8xf32> to vector<1x1x8x8xf32>
    %52 = vector.shape_cast %48 : vector<1x8x8xf32> to vector<1x1x8x8xf32>
    %53 = vector.shape_cast %49 : vector<1x8x8xf32> to vector<1x1x8x8xf32>
    %54 = tpu.concatenate %50, %51, %52, %53 in 0 : vector<1x1x8x8xf32>, vector<1x1x8x8xf32>, vector<1x1x8x8xf32>, vector<1x1x8x8xf32> -> vector<4x1x8x8xf32>
    %55 = vector.shape_cast %54 : vector<4x1x8x8xf32> to vector<4x8x8xf32>
    %cst_15 = arith.constant dense<0.000000e+00> : vector<4x8x8xf32>
    %56 = tpu.matmul %31, %43, %cst_15 {dimension_numbers = #tpu.dot_dimension_numbers<[2], [2], [1], [1], [0, 0, 0, 1, 1, 1], [0], [0]>} : vector<4x8x8xf32>, vector<4x8x8xf32>, vector<4x8x8xf32> -> vector<4x8x8xf32>
    %cst_16 = arith.constant 0.353553385 : f32
    %57 = vector.broadcast %cst_16 : f32 to vector<4x8x8xf32>
    %58 = arith.mulf %56, %57 : vector<4x8x8xf32>
    %59 = vector.shape_cast %58 : vector<4x8x8xf32> to vector<4x1x8x8xf32>
    %cst_17 = arith.constant 0xFF800000 : f32
    %60 = vector.shape_cast %9 : vector<1x1x8x8xi1> to vector<1x1x8x8xi1>
    %61 = vector.broadcast %60 : vector<1x1x8x8xi1> to vector<4x1x8x8xi1>
    %62 = vector.broadcast %cst_17 : f32 to vector<4x1x8x8xf32>
    %63 = arith.select %61, %59, %62 : vector<4x1x8x8xi1>, vector<4x1x8x8xf32>
    %cst_18 = arith.constant 0.000000e+00 : f32
    %64 = vector.shape_cast %14 : vector<1x1x8x1xi1> to vector<1x1x8x1xi1>
    %65 = vector.broadcast %64 : vector<1x1x8x1xi1> to vector<4x1x8x8xi1>
    %66 = vector.broadcast %cst_18 : f32 to vector<4x1x8x8xf32>
    %67 = arith.select %65, %66, %63 : vector<4x1x8x8xi1>, vector<4x1x8x8xf32>
    %cst_19 = arith.constant dense<0xFF800000> : vector<4x1x8xf32>
    %68 = vector.multi_reduction <maximumf>, %67, %cst_19 [3] : vector<4x1x8x8xf32> to vector<4x1x8xf32>
    %69 = vector.shape_cast %68 : vector<4x1x8xf32> to vector<4x1x8x1xf32>
    %70 = vector.broadcast %69 : vector<4x1x8x1xf32> to vector<4x1x8x8xf32>
    %71 = arith.subf %67, %70 : vector<4x1x8x8xf32>
    %72 = math.exp %71 : vector<4x1x8x8xf32>
    %cst_20 = arith.constant dense<0.000000e+00> : vector<4x1x8xf32>
    %73 = vector.multi_reduction <add>, %72, %cst_20 [3] : vector<4x1x8x8xf32> to vector<4x1x8xf32>
    %74 = vector.shape_cast %73 : vector<4x1x8xf32> to vector<4x1x8x1xf32>
    %75 = tpu.reciprocal %74 {approx = true} : vector<4x1x8x1xf32> -> vector<4x1x8x1xf32>
    %76 = vector.broadcast %75 : vector<4x1x8x1xf32> to vector<4x1x8x8xf32>
    %77 = arith.mulf %72, %76 : vector<4x1x8x8xf32>
    %c0_21 = arith.constant 0 : index
    %c0_22 = arith.constant 0 : index
    %c0_23 = arith.constant 0 : index
    %78 = vector.load %arg4[%c0_21, %c0_22, %c0_23] : memref<1x64x64xf32, #tpu.memory_space<vmem>>, vector<1x64x64xf32>
    %79 = vector.shape_cast %78 : vector<1x64x64xf32> to vector<64x64xf32>
    %c0_24 = arith.constant 0 : index
    %c0_25 = arith.constant 0 : index
    %80 = vector.load %arg7[%c0_24, %c0_25] : memref<64x32xf32, #tpu.memory_space<vmem>>, vector<64x32xf32>
    %cst_26 = arith.constant dense<0.000000e+00> : vector<64x32xf32>
    %81 = tpu.matmul %79, %80, %cst_26 {dimension_numbers = #tpu.dot_dimension_numbers<[1], [0], [0], [1], [0, 0, 1, 1], [], []>} : vector<64x64xf32>, vector<64x32xf32>, vector<64x32xf32> -> vector<64x32xf32>
    %c0_27 = arith.constant 0 : index
    %c0_28 = arith.constant 0 : index
    %82 = vector.load %arg8[%c0_27, %c0_28] : memref<1x32xf32, #tpu.memory_space<vmem>>, vector<1x32xf32>
    %83 = vector.broadcast %82 : vector<1x32xf32> to vector<64x32xf32>
    %84 = arith.addf %81, %83 : vector<64x32xf32>
    %cst_29 = arith.constant 0.000000e+00 : f32
    %85 = vector.broadcast %cst_29 : f32 to vector<64x32xf32>
    %86 = arith.maximumf %84, %85 : vector<64x32xf32>
    %87 = vector.shape_cast %86 : vector<64x32xf32> to vector<1x8x8x32xf32>
    %c0_30 = arith.constant 0 : index
    %c0_31 = arith.constant 0 : index
    %88 = vector.load %arg9[%c0_30, %c0_31] : memref<4x32xf32, #tpu.memory_space<vmem>>, vector<4x32xf32>
    %89 = vector.extract_strided_slice %88 {offsets = [0, 0], sizes = [1, 32], strides = [1, 1]} : vector<4x32xf32> to vector<1x32xf32>
    %90 = vector.shape_cast %89 : vector<1x32xf32> to vector<32xf32>
    %91 = vector.shape_cast %90 : vector<32xf32> to vector<1x1x1x32xf32>
    %92 = vector.broadcast %91 : vector<1x1x1x32xf32> to vector<1x8x8x32xf32>
    %93 = arith.mulf %87, %92 : vector<1x8x8x32xf32>
    %cst_32 = arith.constant dense<0.000000e+00> : vector<1x8x8xf32>
    %94 = vector.multi_reduction <add>, %93, %cst_32 [3] : vector<1x8x8x32xf32> to vector<1x8x8xf32>
    %95 = vector.extract_strided_slice %88 {offsets = [1, 0], sizes = [1, 32], strides = [1, 1]} : vector<4x32xf32> to vector<1x32xf32>
    %96 = vector.shape_cast %95 : vector<1x32xf32> to vector<32xf32>
    %97 = vector.shape_cast %96 : vector<32xf32> to vector<1x1x1x32xf32>
    %98 = vector.broadcast %97 : vector<1x1x1x32xf32> to vector<1x8x8x32xf32>
    %99 = arith.mulf %87, %98 : vector<1x8x8x32xf32>
    %cst_33 = arith.constant dense<0.000000e+00> : vector<1x8x8xf32>
    %100 = vector.multi_reduction <add>, %99, %cst_33 [3] : vector<1x8x8x32xf32> to vector<1x8x8xf32>
    %101 = vector.extract_strided_slice %88 {offsets = [2, 0], sizes = [1, 32], strides = [1, 1]} : vector<4x32xf32> to vector<1x32xf32>
    %102 = vector.shape_cast %101 : vector<1x32xf32> to vector<32xf32>
    %103 = vector.shape_cast %102 : vector<32xf32> to vector<1x1x1x32xf32>
    %104 = vector.broadcast %103 : vector<1x1x1x32xf32> to vector<1x8x8x32xf32>
    %105 = arith.mulf %87, %104 : vector<1x8x8x32xf32>
    %cst_34 = arith.constant dense<0.000000e+00> : vector<1x8x8xf32>
    %106 = vector.multi_reduction <add>, %105, %cst_34 [3] : vector<1x8x8x32xf32> to vector<1x8x8xf32>
    %107 = vector.extract_strided_slice %88 {offsets = [3, 0], sizes = [1, 32], strides = [1, 1]} : vector<4x32xf32> to vector<1x32xf32>
    %108 = vector.shape_cast %107 : vector<1x32xf32> to vector<32xf32>
    %109 = vector.shape_cast %108 : vector<32xf32> to vector<1x1x1x32xf32>
    %110 = vector.broadcast %109 : vector<1x1x1x32xf32> to vector<1x8x8x32xf32>
    %111 = arith.mulf %87, %110 : vector<1x8x8x32xf32>
    %cst_35 = arith.constant dense<0.000000e+00> : vector<1x8x8xf32>
    %112 = vector.multi_reduction <add>, %111, %cst_35 [3] : vector<1x8x8x32xf32> to vector<1x8x8xf32>
    %113 = vector.shape_cast %94 : vector<1x8x8xf32> to vector<1x1x8x8xf32>
    %114 = vector.shape_cast %100 : vector<1x8x8xf32> to vector<1x1x8x8xf32>
    %115 = vector.shape_cast %106 : vector<1x8x8xf32> to vector<1x1x8x8xf32>
    %116 = vector.shape_cast %112 : vector<1x8x8xf32> to vector<1x1x8x8xf32>
    %117 = tpu.concatenate %113, %114, %115, %116 in 0 : vector<1x1x8x8xf32>, vector<1x1x8x8xf32>, vector<1x1x8x8xf32>, vector<1x1x8x8xf32> -> vector<4x1x8x8xf32>
    %c0_36 = arith.constant 0 : index
    %c0_37 = arith.constant 0 : index
    %c0_38 = arith.constant 0 : index
    %c0_39 = arith.constant 0 : index
    %118 = vector.load %arg10[%c0_36, %c0_37, %c0_38, %c0_39] : memref<4x1x1x1xf32, #tpu.memory_space<vmem>>, vector<4x1x1x1xf32>
    %119 = vector.broadcast %118 : vector<4x1x1x1xf32> to vector<4x1x8x8xf32>
    %120 = arith.addf %117, %119 : vector<4x1x8x8xf32>
    %cst_40 = arith.constant 0xFF800000 : f32
    %121 = vector.shape_cast %9 : vector<1x1x8x8xi1> to vector<1x1x8x8xi1>
    %122 = vector.broadcast %121 : vector<1x1x8x8xi1> to vector<4x1x8x8xi1>
    %123 = vector.broadcast %cst_40 : f32 to vector<4x1x8x8xf32>
    %124 = arith.select %122, %120, %123 : vector<4x1x8x8xi1>, vector<4x1x8x8xf32>
    %cst_41 = arith.constant 0.000000e+00 : f32
    %125 = vector.shape_cast %14 : vector<1x1x8x1xi1> to vector<1x1x8x1xi1>
    %126 = vector.broadcast %125 : vector<1x1x8x1xi1> to vector<4x1x8x8xi1>
    %127 = vector.broadcast %cst_41 : f32 to vector<4x1x8x8xf32>
    %128 = arith.select %126, %127, %124 : vector<4x1x8x8xi1>, vector<4x1x8x8xf32>
    %cst_42 = arith.constant dense<0xFF800000> : vector<4x1x8xf32>
    %129 = vector.multi_reduction <maximumf>, %128, %cst_42 [3] : vector<4x1x8x8xf32> to vector<4x1x8xf32>
    %130 = vector.shape_cast %129 : vector<4x1x8xf32> to vector<4x1x8x1xf32>
    %131 = vector.broadcast %130 : vector<4x1x8x1xf32> to vector<4x1x8x8xf32>
    %132 = arith.subf %128, %131 : vector<4x1x8x8xf32>
    %133 = math.exp %132 : vector<4x1x8x8xf32>
    %cst_43 = arith.constant dense<0.000000e+00> : vector<4x1x8xf32>
    %134 = vector.multi_reduction <add>, %133, %cst_43 [3] : vector<4x1x8x8xf32> to vector<4x1x8xf32>
    %135 = vector.shape_cast %134 : vector<4x1x8xf32> to vector<4x1x8x1xf32>
    %136 = tpu.reciprocal %135 {approx = true} : vector<4x1x8x1xf32> -> vector<4x1x8x1xf32>
    %137 = vector.broadcast %136 : vector<4x1x8x1xf32> to vector<4x1x8x8xf32>
    %138 = arith.mulf %133, %137 : vector<4x1x8x8xf32>
    %139 = arith.addf %77, %138 : vector<4x1x8x8xf32>
    %cst_44 = arith.constant dense<0.000000e+00> : vector<4x1x8xf32>
    %140 = vector.multi_reduction <add>, %139, %cst_44 [3] : vector<4x1x8x8xf32> to vector<4x1x8xf32>
    %141 = vector.shape_cast %140 : vector<4x1x8xf32> to vector<4x1x8x1xf32>
    %142 = vector.broadcast %141 : vector<4x1x8x1xf32> to vector<4x1x8x8xf32>
    %143 = arith.divf %139, %142 : vector<4x1x8x8xf32>
    %144 = vector.shape_cast %143 : vector<4x1x8x8xf32> to vector<4x8x8xf32>
    %cst_45 = arith.constant dense<0.000000e+00> : vector<4x8x8xf32>
    %145 = tpu.matmul %144, %55, %cst_45 {dimension_numbers = #tpu.dot_dimension_numbers<[2], [1], [1], [2], [0, 0, 0, 1, 1, 2], [0], [0]>} : vector<4x8x8xf32>, vector<4x8x8xf32>, vector<4x8x8xf32> -> vector<4x8x8xf32>
    %146 = vector.shape_cast %145 : vector<4x8x8xf32> to vector<4x1x8x8xf32>
    %147 = vector.extract_strided_slice %146 {offsets = [0, 0, 0, 0], sizes = [1, 1, 8, 8], strides = [1, 1, 1, 1]} : vector<4x1x8x8xf32> to vector<1x1x8x8xf32>
    %148 = vector.shape_cast %147 : vector<1x1x8x8xf32> to vector<1x8x8xf32>
    %149 = vector.extract_strided_slice %146 {offsets = [1, 0, 0, 0], sizes = [1, 1, 8, 8], strides = [1, 1, 1, 1]} : vector<4x1x8x8xf32> to vector<1x1x8x8xf32>
    %150 = vector.shape_cast %149 : vector<1x1x8x8xf32> to vector<1x8x8xf32>
    %151 = vector.extract_strided_slice %146 {offsets = [2, 0, 0, 0], sizes = [1, 1, 8, 8], strides = [1, 1, 1, 1]} : vector<4x1x8x8xf32> to vector<1x1x8x8xf32>
    %152 = vector.shape_cast %151 : vector<1x1x8x8xf32> to vector<1x8x8xf32>
    %153 = vector.extract_strided_slice %146 {offsets = [3, 0, 0, 0], sizes = [1, 1, 8, 8], strides = [1, 1, 1, 1]} : vector<4x1x8x8xf32> to vector<1x1x8x8xf32>
    %154 = vector.shape_cast %153 : vector<1x1x8x8xf32> to vector<1x8x8xf32>
    %155 = tpu.concatenate %148, %150, %152, %154 in 2 : vector<1x8x8xf32>, vector<1x8x8xf32>, vector<1x8x8xf32>, vector<1x8x8xf32> -> vector<1x8x32xf32>
    %156 = vector.shape_cast %155 : vector<1x8x32xf32> to vector<8x32xf32>
    %c0_46 = arith.constant 0 : index
    %c0_47 = arith.constant 0 : index
    %157 = vector.load %arg11[%c0_46, %c0_47] : memref<32x32xf32, #tpu.memory_space<vmem>>, vector<32x32xf32>
    %cst_48 = arith.constant dense<0.000000e+00> : vector<8x32xf32>
    %158 = tpu.matmul %156, %157, %cst_48 {dimension_numbers = #tpu.dot_dimension_numbers<[1], [0], [0], [1], [0, 0, 1, 1], [], []>} : vector<8x32xf32>, vector<32x32xf32>, vector<8x32xf32> -> vector<8x32xf32>
    %c0_49 = arith.constant 0 : index
    %c0_50 = arith.constant 0 : index
    %159 = vector.load %arg12[%c0_49, %c0_50] : memref<1x32xf32, #tpu.memory_space<vmem>>, vector<1x32xf32>
    %160 = vector.broadcast %159 : vector<1x32xf32> to vector<8x32xf32>
    %161 = arith.addf %158, %160 : vector<8x32xf32>
    %162 = arith.addf %1, %161 : vector<8x32xf32>
    %cst_51 = arith.constant dense<0.000000e+00> : vector<8xf32>
    %163 = vector.multi_reduction <add>, %162, %cst_51 [1] : vector<8x32xf32> to vector<8xf32>
    %164 = vector.shape_cast %163 : vector<8xf32> to vector<8x1xf32>
    %cst_52 = arith.constant 3.200000e+01 : f32
    %165 = vector.broadcast %cst_52 : f32 to vector<8x1xf32>
    %166 = arith.divf %164, %165 : vector<8x1xf32>
    %167 = vector.broadcast %166 : vector<8x1xf32> to vector<8x32xf32>
    %168 = arith.subf %162, %167 : vector<8x32xf32>
    %169 = arith.mulf %168, %168 : vector<8x32xf32>
    %cst_53 = arith.constant dense<0.000000e+00> : vector<8xf32>
    %170 = vector.multi_reduction <add>, %169, %cst_53 [1] : vector<8x32xf32> to vector<8xf32>
    %171 = vector.shape_cast %170 : vector<8xf32> to vector<8x1xf32>
    %cst_54 = arith.constant 3.200000e+01 : f32
    %172 = vector.broadcast %cst_54 : f32 to vector<8x1xf32>
    %173 = arith.divf %171, %172 : vector<8x1xf32>
    %174 = vector.broadcast %166 : vector<8x1xf32> to vector<8x32xf32>
    %175 = arith.subf %162, %174 : vector<8x32xf32>
    %cst_55 = arith.constant 9.99999974E-6 : f32
    %176 = vector.broadcast %cst_55 : f32 to vector<8x1xf32>
    %177 = arith.addf %173, %176 : vector<8x1xf32>
    %178 = math.rsqrt %177 : vector<8x1xf32>
    %179 = vector.broadcast %178 : vector<8x1xf32> to vector<8x32xf32>
    %180 = arith.mulf %175, %179 : vector<8x32xf32>
    %c0_56 = arith.constant 0 : index
    %c0_57 = arith.constant 0 : index
    %181 = vector.load %arg13[%c0_56, %c0_57] : memref<1x32xf32, #tpu.memory_space<vmem>>, vector<1x32xf32>
    %182 = vector.broadcast %181 : vector<1x32xf32> to vector<8x32xf32>
    %183 = arith.mulf %180, %182 : vector<8x32xf32>
    %c0_58 = arith.constant 0 : index
    %c0_59 = arith.constant 0 : index
    %184 = vector.load %arg14[%c0_58, %c0_59] : memref<1x32xf32, #tpu.memory_space<vmem>>, vector<1x32xf32>
    %185 = vector.broadcast %184 : vector<1x32xf32> to vector<8x32xf32>
    %186 = arith.addf %183, %185 : vector<8x32xf32>
    %187 = vector.shape_cast %186 : vector<8x32xf32> to vector<1x8x32xf32>
    %c0_60 = arith.constant 0 : index
    %c0_61 = arith.constant 0 : index
    %c0_62 = arith.constant 0 : index
    %188 = vector.load %arg15[%c0_60, %c0_61, %c0_62] : memref<1x8x32xf32, #tpu.memory_space<vmem>>, vector<1x8x32xf32>
    tpu.vector_store %arg15[%c0_60, %c0_61, %c0_62], %187 {strides = array<i32>} : memref<1x8x32xf32, #tpu.memory_space<vmem>>, vector<1x8x32xf32>,
    return
  }
  func.func @transform_0(%arg0: i32) -> (i32, i32, i32) {
    %c0_i32 = arith.constant 0 : i32
    %c0_i32_0 = arith.constant 0 : i32
    %c0_i32_1 = arith.constant 0 : i32
    return %arg0, %c0_i32, %c0_i32_0 : i32, i32, i32
  }
  func.func @transform_1(%arg0: i32) -> (i32, i32, i32) {
    %c0_i32 = arith.constant 0 : i32
    %c0_i32_0 = arith.constant 0 : i32
    %c0_i32_1 = arith.constant 0 : i32
    return %arg0, %c0_i32, %c0_i32_0 : i32, i32, i32
  }
  func.func @transform_2(%arg0: i32) -> (i32, i32, i32) {
    %c0_i32 = arith.constant 0 : i32
    %c0_i32_0 = arith.constant 0 : i32
    %c0_i32_1 = arith.constant 0 : i32
    return %arg0, %c0_i32, %c0_i32_0 : i32, i32, i32
  }
  func.func @transform_3(%arg0: i32) -> (i32, i32, i32) {
    %c0_i32 = arith.constant 0 : i32
    %c0_i32_0 = arith.constant 0 : i32
    %c0_i32_1 = arith.constant 0 : i32
    return %arg0, %c0_i32, %c0_i32_0 : i32, i32, i32
  }
  func.func @transform_4(%arg0: i32) -> (i32, i32) {
    %c0_i32 = arith.constant 0 : i32
    %c0_i32_0 = arith.constant 0 : i32
    %c0_i32_1 = arith.constant 0 : i32
    return %c0_i32, %c0_i32_0 : i32, i32
  }
  func.func @transform_5(%arg0: i32) -> (i32, i32) {
    %c0_i32 = arith.constant 0 : i32
    %c0_i32_0 = arith.constant 0 : i32
    %c0_i32_1 = arith.constant 0 : i32
    return %c0_i32, %c0_i32_0 : i32, i32
  }
  func.func @transform_6(%arg0: i32) -> (i32, i32) {
    %c0_i32 = arith.constant 0 : i32
    %c0_i32_0 = arith.constant 0 : i32
    %c0_i32_1 = arith.constant 0 : i32
    return %c0_i32, %c0_i32_0 : i32, i32
  }
  func.func @transform_7(%arg0: i32) -> (i32, i32) {
    %c0_i32 = arith.constant 0 : i32
    %c0_i32_0 = arith.constant 0 : i32
    %c0_i32_1 = arith.constant 0 : i32
    return %c0_i32, %c0_i32_0 : i32, i32
  }
  func.func @transform_8(%arg0: i32) -> (i32, i32) {
    %c0_i32 = arith.constant 0 : i32
    %c0_i32_0 = arith.constant 0 : i32
    %c0_i32_1 = arith.constant 0 : i32
    return %c0_i32, %c0_i32_0 : i32, i32
  }
  func.func @transform_9(%arg0: i32) -> (i32, i32, i32, i32) {
    %c0_i32 = arith.constant 0 : i32
    %c0_i32_0 = arith.constant 0 : i32
    %c0_i32_1 = arith.constant 0 : i32
    %c0_i32_2 = arith.constant 0 : i32
    %c0_i32_3 = arith.constant 0 : i32
    return %c0_i32, %c0_i32_0, %c0_i32_1, %c0_i32_2 : i32, i32, i32, i32
  }
  func.func @transform_10(%arg0: i32) -> (i32, i32) {
    %c0_i32 = arith.constant 0 : i32
    %c0_i32_0 = arith.constant 0 : i32
    %c0_i32_1 = arith.constant 0 : i32
    return %c0_i32, %c0_i32_0 : i32, i32
  }
  func.func @transform_11(%arg0: i32) -> (i32, i32) {
    %c0_i32 = arith.constant 0 : i32
    %c0_i32_0 = arith.constant 0 : i32
    %c0_i32_1 = arith.constant 0 : i32
    return %c0_i32, %c0_i32_0 : i32, i32
  }
  func.func @transform_12(%arg0: i32) -> (i32, i32) {
    %c0_i32 = arith.constant 0 : i32
    %c0_i32_0 = arith.constant 0 : i32
    %c0_i32_1 = arith.constant 0 : i32
    return %c0_i32, %c0_i32_0 : i32, i32
  }
  func.func @transform_13(%arg0: i32) -> (i32, i32) {
    %c0_i32 = arith.constant 0 : i32
    %c0_i32_0 = arith.constant 0 : i32
    %c0_i32_1 = arith.constant 0 : i32
    return %c0_i32, %c0_i32_0 : i32, i32
  }
  func.func @transform_14(%arg0: i32) -> (i32, i32, i32) {
    %c0_i32 = arith.constant 0 : i32
    %c0_i32_0 = arith.constant 0 : i32
    %c0_i32_1 = arith.constant 0 : i32
    return %arg0, %c0_i32, %c0_i32_0 : i32, i32, i32
  }
}

</mosaic_0001>

<bundles_post_ra>
// kernel: tpu_custom_call.1
= control target key start
LH: loop header
LB: loop body
LE: loop exit
PB: predicated region body
PF: predicated region fallthrough
CT: control target
= control target key end

     0   :  { %s2736_s0 = inlined_call_operand.vmem [shape: f32[2,8,32], index: 0, kind: input, shape index: {}]   ;;  %s2737_s1 = inlined_call_operand.vmem [shape: f32[2,8,1], index: 1, kind: input, shape index: {}]   ;;  %s2738_s2 = inlined_call_operand.vmem [shape: f32[2,1,8], index: 2, kind: input, shape index: {}]   ;;  %s2739_s3 = inlined_call_operand.hbm [shape: f32[2,64,64], index: 3, kind: input, shape index: {}]   ;;  %s2740_s4 = inlined_call_operand.vmem [shape: f32[32,96], index: 4, kind: input, shape index: {}]   ;;  %s2741_s5 = inlined_call_operand.vmem [shape: f32[1,96], index: 5, kind: input, shape index: {}]   ;;  %s2742_s6 = inlined_call_operand.vmem [shape: f32[64,32], index: 6, kind: input, shape index: {}]   ;;  %s2743_s7 = inlined_call_operand.vmem [shape: f32[1,32], index: 7, kind: input, shape index: {}]   ;;  %s2744_s8 = inlined_call_operand.vmem [shape: f32[4,32], index: 8, kind: input, shape index: {}]   ;;  %s2745_s9 = inlined_call_operand.vmem [shape: f32[4,1,1,1], index: 9, kind: input, shape index: {}]   ;;  %s2746_s10 = inlined_call_operand.vmem [shape: f32[32,32], index: 10, kind: input, shape index: {}]   ;;  %s2747_s11 = inlined_call_operand.vmem [shape: f32[1,32], index: 11, kind: input, shape index: {}]   ;;  %s2748_s12 = inlined_call_operand.vmem [shape: f32[1,32], index: 12, kind: input, shape index: {}]   ;;  %s2749_s13 = inlined_call_operand.vmem [shape: f32[1,32], index: 13, kind: input, shape index: {}]   ;;  %s2750_s14 = inlined_call_operand.hbm [shape: f32[2,8,32], index: 14, kind: output, shape index: {}]  }
   0x1   :  { %2759 = sst [smem:[#allocation14_spill]] %s2749_s13 }
   0x2   :  { %2760 = sst [smem:[#allocation15_spill]] %s2750_s14 }
   0x3   :  { %19 = vsyncpa [#allocation3], 0 }
   0x4   :  { %21 = vsyncpa [#allocation3 + $0x1], 0 }
   0x5   :  { %22 = vsyncpa [#allocation4], 0 }
   0x6   :  { %24 = vsyncpa [#allocation4 + $0x1], 0  ;;  %s2045_s29 = smov 0   ;;  %s2047_s30 = smov 0  }
   0x7   :  { %s2049_s15 = smov 0   ;;  %s2051_s16 = smov 0  }
   0x8 LB: > { %2761 = sst [smem:[#allocation8_spill]] %s1944_s29  ;;  %s2066_s17 = sadd.s32 4294967295, %s1956_s16   ;;  %s1956_s16 = sphi %s2051_s16, %s2778_s16   ;;  %s1952_s15 = sphi %s2049_s15, %s2780_s15   ;;  %s1948_s30 = sphi %s2047_s30, %s2782_s30   ;;  %s1944_s29 = sphi %s2045_s29, %s2781_s29  }
   0x9   : > { %2762 = sst [smem:[#allocation9_spill]] %s1952_s15  ;;  %s1685_s18 = sadd.s32 4294967294, %s1956_s16  }
   0xa   : > { %s2070_s19 = sadd.s32 1, %s1956_s16   ;;  %s115_s20 = sadd.s32 1, %s1952_s15 }
   0xb   : > { %2763 = sst [smem:[#allocation10_spill]] %s2070_s19  ;;  %s112_s21 = ssub.s32 %s1956_s16, %s2070_s19 }
   0xc   : > { %p122_p0 = scmp.ne.s32.totalorder %s1952_s15, %s1948_s30  ;;  %p113_p1 = scmp.eq.s32.totalorder %s112_s21, 0 }
   0xd   : > { %p123_p2 = scmp.eq.s32.totalorder %s1956_s16, 0  ;;  %p128_p3 = scmp.ne.s32.totalorder %s1948_s30, %s1944_s29 }
   0xe   : > { %p129_p4 = scmp.eq.s32.totalorder %s2066_s17, 0  ;;  %p362_p7 = scmp.eq.s32.totalorder %s2066_s17, 1 }
   0xf   : > { %s2082_s22 = scalar_select %p113_p1, %s1952_s15, %s115_s20  }
  0x10   : > { %p2084_p5 = por %p123_p2, %p122_p0  ;;  %p2088_p6 = por %p129_p4, %p128_p3 }
  0x11   : > { %2764 = sst [smem:[#allocation11_spill]] %s2082_s22  ;;  %p368_p8 = scmp.eq.s32.totalorder %s1685_s18, 1 }
  0x12   : > { %p1751_p10 = scmp.lt.s32.totalorder %s1956_s16, 2  ;;  %p2095_p11 = por %p362_p7, %p122_p0 }
  0x13   : > { %p2099_p12 = por %p368_p8, %p128_p3  ;;  %s438_s27 = sand.u32 1, %s1952_s15  }
  0x14   : > { %s2767_s25 = scalar_select %p2095_p11, 1, 0 }
  0x15   : > { %s2769_s26 = scalar_select %p2099_p12, 1, 0 }
  0x16   : > { %2768 = sst [smem:[#allocation12_spill]] %s2767_s25  ;;  %s1722_s28 = sshll.u32 %s1956_s16, 6 }
  0x17   : > { %2770 = sst [smem:[#allocation13_spill]] %s2769_s26  ;;  %s1688_s20 = sshll.u32 %s438_s27, 6 }
  0x18   : > { %s447_s19 = scalar_lea.hbm %s2739_s3, %s1722_s28  ;;  %s442_s18 = scalar_lea.vmem [#allocation2], %s1688_s20 }
  0x19   : > { %s448_s29 = sshll.u32 %s447_s19, 4  ;;  %s450_s13 = sshll.u32 %s442_s18, 4  ;;  %s449_s29 = int_to_ptr.hbm [resolvable:$true] %s448_s29  ;;  %s451_s13 = int_to_ptr.vmem [resolvable:$true] %s450_s13 }
  0x1a   : > { %p2110_p13 = pnand %p1751_p10, %p2084_p5  ;;  %p1691_p0 = scmp.ge.s32.totalorder %s1956_s16, 1 }
  0x1b   : > { %p458_p1 = scmp.lt.s32.totalorder %s1956_s16, 3  ;;  %s439_s15 = scalar_lea.sflag [#allocation3], %s438_s27 }
  0x1c   : > { %s1860_s26 = sshra.s32 %s449_s29, 4  ;;  %p1864_p3 = pneg %p2110_p13  ;;  %s1861_s26 = int_to_ptr.hbm [resolvable:$true] %s1860_s26 }
  0x1d   : > { %s1862_s25 = scalar_lea.hbm %s1861_s26, 64  ;;  %s1867_s23 = scalar_lea.hbm %s2739_s3, 128 }
  0x1e   : > { %p1863_p2 = scmp.ne.s32.totalorder %s1861_s26, %s1862_s25  ;;  %p1868_p5 = scmp.lt.s32.totalorder %s1861_s26, %s2739_s3 }
  0x1f   : > { %p1869_p8 = scmp.lt.s32.totalorder %s1867_s23, %s1862_s25 }
  0x20   : > { %p1865_p4 = pnand %p1864_p3, %p1863_p2 }
  0x21   : > { %p1870_p10 = por %p1869_p8, %p1868_p5 }
  0x22   : > { %p1866_p7 = pneg %p1865_p4 }
  0x24   : > { %p1871_p9 = pnand %p1870_p10, %p1866_p7 }
  0x26   : > { %1874 = shalt.err (!%p1871_p9)
}
  0x27   : > { %s1958_s27 = smov 128   ;;  %s1959_s21 = smov 8  }
  0x28   : > { %1746 = dma.hbm_to_vmem [thread:$0]  (!%p2110_p13), %s449_s29, 1024, %s451_s13, %s439_s15, %s1958_s27, %s1958_s27, %s1959_s21  }
  0x29   : > { %p459_p2 = pnand %p1691_p0, %p458_p1 }
  0x2a   : > { %s2131_s18 = sand.u32 (!%p459_p2), 1, %s1948_s30  }
  0x2b   : > { %462 = sbr.rel (%p459_p2) target bundleno = 1914 (0x77a), region = 76  ;;  %s1692_s25 = sshll.u32 (!%p459_p2), %s2131_s18, 6 }
  0x2c   : > { %s465_s26 = scalar_lea.sflag (!%p459_p2), [#allocation3], %s2131_s18  ;;  %s2135_s19 = scalar_lea.vmem (!%p459_p2), [#allocation2], %s1692_s25 }
  0x30   : > { %1935 = dma.done.wait (%p2088_p6), %s465_s26, 1024  }
  0x31   : > { %1937 = vsyncadd (%p2088_p6), %s465_s26, 4294966272  ;;  %p525_p9 = scmp.lt.s32.totalorder %s2066_s17, 1  ;;  %v557_v0 = vld [vmem:[%s2740_s4 + $0x18] sm:$0xff]  ;;  %v556_v2 = vld [vmem:[%s2740_s4 + $0x10] sm:$0xff]  ;;  %vm562_vm0 = vcmask 261120   ;;  %v1960_v13 = vmov 0  }
  0x32   : > { %v2152_v1 = vld [vmem:[%s2742_s6 + $0x38] sm:$0xff]  ;;  %578 = vmatpush.msra.mxu0 %v557_v0  ;;  %v2161_v3 = vld [vmem:[%s2742_s6 + $0x30] sm:$0xff]  ;;  %v555_v4 = vld [vmem:[%s2740_s4 + $0x8] sm:$0xff]  ;;  %1797 = vset.pattern.permute.xlu2 %v1960_v13  ;;  %vm777_vm1 = vcmask 523264   ;;  %s1961_s25 = smov 120   ;;  %s1963_s29 = smov 96  }
  0x33   : > { %s2143_s13 = scalar_select %p525_p9, %s2066_s17, 1  ;;  %1723 = vmatpush.msra.mxu2 %v2152_v1  ;;  %v2169_v5 = vld [vmem:[%s2742_s6 + $0x28] sm:$0xff]  ;;  %v554_v6 = vld [vmem:[%s2740_s4] sm:$0xff]  ;;  %v2192_v9 = vld [vmem:[%s2742_s6 + $0x18] sm:$0xff]  ;;  %1798 = vset.pattern.permute.xlu0 %v1960_v13  ;;  %vm549_vm2 = vcmask 64512   ;;  %vm1206_vm5 = vcmask 1041409  }
  0x34   : > { %579 = vmatpush.msra.mxu0 %v556_v2  ;;  %v2185_v7 = vld [vmem:[%s2742_s6 + $0x20] sm:$0xff]  ;;  %v2199_v10 = vld [vmem:[%s2742_s6 + $0x10] sm:$0xff]  ;;  %v2208_v12 = vld [vmem:[%s2742_s6 + $0x8] sm:$0xff]  ;;  %1799 = vset.pattern.permute.xlu1 %v1960_v13  ;;  %s1964_s15 = smov 104   ;;  %vm1208_vm6 = vcmask 1042434   ;;  %vm1210_vm7 = vcmask 1043459  }
  0x35   : > { %s1694_s14 = sshll.u32 %s2143_s13, 3  ;;  %1725 = vmatpush.msra.mxu2 %v2161_v3  ;;  %v1805_v11 = vld [vmem:[%s2745_s9] ss:$0 sm:$0xff]  ;;  %v759_v15 = vld [vmem:[%s2135_s19 + $0x10] sm:$0xff]  ;;  %v760_v17 = vld [vmem:[%s2135_s19 + $0x18] sm:$0xff]  ;;  %s535_s20 = scalar_lea.vmem %s2738_s2, %s2143_s13  ;;  %vm1212_vm8 = vcmask 1044484  }
  0x36   : > { %s2176_s23 = scalar_lea.vmem %s2736_s0, %s1694_s14  ;;  %580 = vmatpush.msra.mxu0 %v555_v4  ;;  %997 = vperm.xlu2 %1797, %v1805_v11   ;;  %v2214_v14 = vld [vmem:[%s2742_s6] sm:$0xff]  ;;  %s532_s26 = scalar_lea.vmem %s2737_s1, %s1694_s14  ;;  %v762_v21 = vld [vmem:[%s2135_s19 + $0x28] sm:$0xff]  ;;  %vm1214_vm9 = vcmask 1045509   ;;  %vm1216_vm10 = vcmask 1046534   ;;  %vm1218_vm11 = vcmask 1047559  }
  0x37   : > { %1727 = vmatpush.msra.mxu2 %v2169_v5  ;;  %v536_v8 = vld [vmem:[%s2176_s23] sm:$0xff]  ;;  %s2772_s22 = sld [smem:[#allocation15_spill]] }
  0x38   : > { %581 = vmatpush.msra.mxu0 %v554_v6  ;;  %v537_v16 = vld [vmem:[%s532_s26] sm:$0xff]  ;;  %s1962_s26 = smov 112   ;;  %s2774_s13 = sld [smem:[#allocation14_spill]] }
  0x39   : > { %1729 = vmatpush.msra.mxu2 %v2185_v7  ;;  %1696 = vmatmul.msk.f32.vlgmr.msra.gmra.mxu0 %vm562_vm0, %v536_v8  ;;  %v1806_v18 = vld [vmem:[%s2745_s9 + $0x1] ss:$0 sm:$0xff]  ;;  %v1807_v20 = vld [vmem:[%s2745_s9 + $0x2] ss:$0 sm:$0xff]  ;;  %v1808_v22 = vld [vmem:[%s2741_s5] ss:$0 sm:$0xff] }
  0x3a   : > { %v761_v19 = vld [vmem:[%s2135_s19 + $0x20] sm:$0xff] }
  0x3b   : > { %1731 = vmatpush.msra.mxu2 %v2192_v9  ;;  %v2254_v25 = vld [vmem:[%s2743_s7] ss:$0 sm:$0xff] }
  0x3c   : > { %v851_v26 = vld [vmem:[%s2744_s8] sm:$0xf] }
  0x3d   : > { %1733 = vmatpush.msra.mxu2 %v2199_v10  ;;  %v2260_v29 = vperm.slane %v851_v26, 2  ;;  %v2265_v35 = vperm.slane %v851_v26, 0  ;;  %v2269_v39 = vperm.slane %v851_v26, 3  ;;  %v2274_v44 = vperm.slane %v851_v26, 1 }
  0x3e   : > { %541 = vperm.xlu2 %1797, %v537_v16   ;;  %v1810_v16 = vld [vmem:[%s535_s20] ss:$0 sm:$0xff] }
  0x3f   : > { %1735 = vmatpush.msra.mxu2 %v2208_v12 }
  0x41   : > { %1737 = vmatpush.msra.mxu2 %v2214_v14 }
  0x42   : > { %1707 = vmatmul.msk.f32.vlgmr.msra.gmra.mxu2 %vm777_vm1, %v759_v15 }
  0x46   : > { %1001 = vperm.xlu2 %1797, %v1806_v18  }
  0x4a   : > { %1708 = vmatmul.msk.f32.gmra.mxu2 %vm777_vm1, %v760_v17 }
  0x4e   : > { %1005 = vperm.xlu2 %1797, %v1807_v20  }
  0x52   : > { %1709 = vmatmul.msk.f32.gmra.mxu2 %vm777_vm1, %v761_v19 }
  0x5a   : > { %1710 = vmatmul.msk.f32.gmra.mxu2 %vm777_vm1, %v762_v21 }
  0x90   : > { %v2284_v54 = vpop.permute.xlu2 %997 }
  0x98   : > { %v542_v63 = vpop.permute.xlu2 %541 }
  0x99   : > { %v2308_v19 = vmul.f32 %v1810_v16, %v542_v63 }
  0x9b   : > { %v550_v21 = vsel %vm549_vm2, %v2308_v19, -inf  ;;  %vm548_vm3 = vcmp.gt.f32.partialorder %v2308_v19, 0.5 }
  0xa0   : > { %v2299_v15 = vpop.permute.xlu2 %1001 }
  0xb6   : > { %v583_v23 = vpop.f32.mrf.mxu0 }
  0xb7   : > { %v2244_v24 = vadd.f32 %v1808_v22, %v583_v23  ;;  %v2313_v22 = vpop.permute.xlu2 %1005 }
  0xb9   : > { %587 = vrot.lane.b32.xlu2 %v2244_v24, %s1961_s25  ;;  %589 = vrot.lane.b32.xlu0 %v2244_v24, %s1962_s26  ;;  %s1966_s25 = smov 24   ;;  %s1967_s26 = smov 8  }
  0xc1   : > { %593 = vrot.lane.b32.xlu2 %v2244_v24, %s1963_s29  ;;  %591 = vrot.lane.b32.xlu0 %v2244_v24, %s1964_s15 }
  0xc5   : > { %v825_v27 = vpop.f32.mrf.mxu2 }
  0xc6   : > { %v826_v28 = vadd.f32 %v2254_v25, %v825_v27 }
  0xc8   : > { %v845_v30 = vmax.f32 %v826_v28, 0.0  ;;  %v1811_v28 = vld [vmem:[%s2745_s9 + $0x3] ss:$0 sm:$0xff] }
  0xca   : > { %v921_v31 = vmul.f32 %v2260_v29, %v845_v30  ;;  %v954_v48 = vmul.f32 %v2269_v39, %v845_v30  ;;  %v855_v50 = vmul.f32 %v2265_v35, %v845_v30  ;;  %v888_v57 = vmul.f32 %v2274_v44, %v845_v30 }
  0xcc   : > { %v933_v32 = vsel %vm562_vm0, %v921_v31, 0.0  ;;  %v966_v51 = vsel %vm562_vm0, %v954_v48, 0.0  ;;  %v867_v53 = vsel %vm562_vm0, %v855_v50, 0.0  ;;  %v900_v61 = vsel %vm562_vm0, %v888_v57, 0.0 }
  0xcd   : > { %v828_v33 = vpop.f32.mrf.mxu2  ;;  %934 = vadd.xlane.f32.xlu1 %v933_v32 }
  0xce   : > { %v829_v34 = vadd.f32 %v2254_v25, %v828_v33 }
  0xd0   : > { %v846_v36 = vmax.f32 %v829_v34, 0.0 }
  0xd2   : > { %v856_v37 = vmul.f32 %v2265_v35, %v846_v36  ;;  %v955_v40 = vmul.f32 %v2269_v39, %v846_v36  ;;  %v889_v45 = vmul.f32 %v2274_v44, %v846_v36  ;;  %v922_v55 = vmul.f32 %v2260_v29, %v846_v36 }
  0xd4   : > { %v870_v38 = vsel %vm562_vm0, %v856_v37, 0.0  ;;  %v969_v41 = vsel %vm562_vm0, %v955_v40, 0.0  ;;  %v903_v47 = vsel %vm562_vm0, %v889_v45, 0.0  ;;  %v936_v58 = vsel %vm562_vm0, %v922_v55, 0.0 }
  0xd5   : > { %871 = vadd.xlane.f32.xlu1 %v870_v38  ;;  %v831_v42 = vpop.f32.mrf.mxu2 }
  0xd6   : > { %v832_v43 = vadd.f32 %v2254_v25, %v831_v42 }
  0xd8   : > { %v847_v46 = vmax.f32 %v832_v43, 0.0 }
  0xda   : > { %v956_v49 = vmul.f32 %v2269_v39, %v847_v46  ;;  %v890_v56 = vmul.f32 %v2274_v44, %v847_v46  ;;  %v857_v0 = vmul.f32 %v2265_v35, %v847_v46  ;;  %v923_v2 = vmul.f32 %v2260_v29, %v847_v46 }
  0xdc   : > { %v972_v52 = vsel %vm562_vm0, %v956_v49, 0.0  ;;  %v906_v59 = vsel %vm562_vm0, %v890_v56, 0.0  ;;  %v873_v6 = vsel %vm562_vm0, %v857_v0, 0.0  ;;  %v939_v8 = vsel %vm562_vm0, %v923_v2, 0.0 }
  0xdd   : > { %970 = vadd.xlane.f32.xlu1 %v969_v41  ;;  %v834_v60 = vpop.f32.mrf.mxu2 }
  0xde   : > { %v835_v62 = vadd.f32 %v2254_v25, %v834_v60 }
  0xe0   : > { %v848_v4 = vmax.f32 %v835_v62, 0.0 }
  0xe2   : > { %v891_v11 = vmul.f32 %v2274_v44, %v848_v4  ;;  %v858_v13 = vmul.f32 %v2265_v35, %v848_v4  ;;  %v957_v20 = vmul.f32 %v2269_v39, %v848_v4  ;;  %v924_v38 = vmul.f32 %v2260_v29, %v848_v4 }
  0xe4   : > { %v909_v17 = vsel %vm562_vm0, %v891_v11, 0.0  ;;  %v876_v18 = vsel %vm562_vm0, %v858_v13, 0.0  ;;  %v975_v23 = vsel %vm562_vm0, %v957_v20, 0.0  ;;  %v942_v40 = vsel %vm562_vm0, %v924_v38, 0.0  ;;  %v764_v13 = vld [vmem:[%s2135_s19 + $0x38] sm:$0xff] }
  0xe5   : > { %904 = vadd.xlane.f32.xlu1 %v903_v47 }
  0xea   : > { %967 = vadd.xlane.f32.xlu2 %v966_v51 }
  0xeb   : > { %868 = vadd.xlane.f32.xlu0 %v867_v53 }
  0xed   : > { %973 = vadd.xlane.f32.xlu1 %v972_v52 }
  0xf2   : > { %937 = vadd.xlane.f32.xlu2 %v936_v58 }
  0xf3   : > { %901 = vadd.xlane.f32.xlu0 %v900_v61 }
  0xf5   : > { %907 = vadd.xlane.f32.xlu1 %v906_v59 }
  0xfb   : > { %874 = vadd.xlane.f32.xlu0 %v873_v6 }
  0xfd   : > { %940 = vadd.xlane.f32.xlu1 %v939_v8 }
 0x103   : > { %910 = vadd.xlane.f32.xlu0 %v909_v17 }
 0x105   : > { %877 = vadd.xlane.f32.xlu1 %v876_v18 }
 0x10b   : > { %551 = vmax.xlane.f32.xlu0 %v550_v21 }
 0x10d   : > { %976 = vadd.xlane.f32.xlu1 %v975_v23 }
 0x113   : > { %v2316_v26 = vpop.permute.xlu2 %587 }
 0x11b   : > { %v594_v27 = vpop.permute.xlu2 %593 }
 0x11c   : > { %1697 = vmatpush.xpose.msk.msrb.mxu0 %vm549_vm2, %v594_v27 }
 0x11f   : > { %1698 = vmatmul.msk.f32.vlgmr.msrb.gmra.mxu0 %vm549_vm2, %v2244_v24  ;;  %1009 = vperm.xlu0 %1798, %v1811_v28  }
 0x127   : > { %619 = vrot.lane.b32.xlu0 %v2316_v26, %s1963_s29 }
 0x12b   : > { %v2326_v30 = vpop.permute.xlu0 %589 }
 0x12c   : > { %645 = vrot.lane.b32.xlu1 %v2326_v30, %s1963_s29 }
 0x133   : > { %v2330_v31 = vpop.permute.xlu0 %591 }
 0x134   : > { %671 = vrot.lane.b32.xlu1 %v2330_v31, %s1963_s29  ;;  %s1968_s29 = smov 16  }
 0x140   : > { %v935_v32 = vpop.xlane.xlu1 %934 }
 0x141   : > { %v1030_v2 = vadd.f32 %v2313_v22, %v935_v32 }
 0x148   : > { %v872_v33 = vpop.xlane.xlu1 %871 }
 0x149   : > { %v1015_v34 = vadd.f32 %v2284_v54, %v872_v33 }
 0x14b   : > { %1086 = vperm.xlu0 %1798, %v1015_v34  }
 0x150   : > { %v971_v36 = vpop.xlane.xlu1 %970 }
 0x158   : > { %v905_v37 = vpop.xlane.xlu1 %904 }
 0x159   : > { %v1023_v61 = vadd.f32 %v2299_v15, %v905_v37 }
 0x15d   : > { %v968_v55 = vpop.xlane.xlu2 %967 }
 0x15e   : > { %943 = vadd.xlane.f32.xlu1 %v942_v40  ;;  %v869_v41 = vpop.xlane.xlu0 %868 }
 0x15f   : > { %v1014_v42 = vadd.f32 %v2284_v54, %v869_v41 }
 0x160   : > { %v974_v43 = vpop.xlane.xlu1 %973 }
 0x161   : > { %1083 = vperm.xlu2 %1797, %v1014_v42  }
 0x165   : > { %v938_v0 = vpop.xlane.xlu2 %937 }
 0x166   : > { %v902_v46 = vpop.xlane.xlu0 %901  ;;  %v1031_v4 = vadd.f32 %v2313_v22, %v938_v0 }
 0x167   : > { %v1022_v62 = vadd.f32 %v2299_v15, %v902_v46 }
 0x168   : > { %v2338_v45 = vpop.xlane.xlu1 %907 }
 0x16e   : > { %v875_v48 = vpop.xlane.xlu0 %874 }
 0x16f   : > { %v1016_v8 = vadd.f32 %v2284_v54, %v875_v48 }
 0x170   : > { %v2340_v47 = vpop.xlane.xlu1 %940 }
 0x176   : > { %v911_v51 = vpop.xlane.xlu0 %910 }
 0x177   : > { %v1025_v52 = vadd.f32 %v2299_v15, %v911_v51 }
 0x178   : > { %v878_v49 = vpop.xlane.xlu1 %877 }
 0x179   : > { %v1017_v50 = vadd.f32 %v2284_v54, %v878_v49 }
 0x17b   : > { %1092 = vperm.xlu0 %1798, %v1017_v50  }
 0x17e   : > { %v2344_v53 = vpop.xlane.xlu0 %551 }
 0x17f   : > { %vm553_vm4 = vcmp.le.f32.partialorder %v2344_v53, 0.5 }
 0x180   : > { %v977_v59 = vpop.xlane.xlu1 %976 }
 0x183   : > { %1116 = vperm.xlu0 %1798, %v1025_v52  }
 0x191   : > { %v2346_v56 = vpop.permute.xlu0 %1009 }
 0x192   : > { %v1039_v57 = vadd.f32 %v2346_v56, %v971_v36  ;;  %v1038_v58 = vadd.f32 %v2346_v56, %v968_v55  ;;  %v1041_v11 = vadd.f32 %v2346_v56, %v977_v59 }
 0x194   : > { %1158 = vperm.xlu2 %1797, %v1039_v57   ;;  %1155 = vperm.xlu1 %1799, %v1038_v58  }
 0x199   : > { %v620_v60 = vpop.permute.xlu0 %619 }
 0x19a   : > { %1699 = vmatpush.xpose.msk.msra.mxu0 %vm549_vm2, %v620_v60 }
 0x19c   : > { %1110 = vperm.xlu2 %1797, %v1023_v61   ;;  %1107 = vperm.xlu1 %1799, %v1022_v62  }
 0x19d   : > { %1700 = vmatmul.msk.f32.vlgmr.msra.gmra.mxu0 %vm549_vm2, %v2316_v26 }
 0x19e   : > { %v646_v63 = vpop.permute.xlu1 %645 }
 0x19f   : > { %1701 = vmatpush.xpose.msk.msra.mxu3 %vm549_vm2, %v646_v63 }
 0x1a2   : > { %1702 = vmatmul.msk.f32.vlgmr.msra.gmra.mxu3 %vm549_vm2, %v2326_v30 }
 0x1a3   : > { %1724 = vmatpush.msrb.mxu3 %v2152_v1 }
 0x1a4   : > { %1134 = vperm.xlu2 %1797, %v1031_v4   ;;  %1131 = vperm.xlu1 %1799, %v1030_v2  }
 0x1a5   : > { %1726 = vmatpush.msrb.mxu3 %v2161_v3 }
 0x1a6   : > { %v672_v6 = vpop.permute.xlu1 %671 }
 0x1a7   : > { %1728 = vmatpush.msrb.mxu3 %v2169_v5  ;;  %1703 = vmatpush.xpose.msk.msra.mxu1 %vm549_vm2, %v672_v6 }
 0x1a9   : > { %1730 = vmatpush.msrb.mxu3 %v2185_v7 }
 0x1aa   : > { %1704 = vmatmul.msk.f32.vlgmr.msra.gmra.mxu1 %vm549_vm2, %v2330_v31 }
 0x1ab   : > { %810 = vmatpush.msrb.mxu1 %v2152_v1  ;;  %1732 = vmatpush.msrb.mxu3 %v2192_v9  ;;  %v763_v1 = vld [vmem:[%s2135_s19 + $0x30] sm:$0xff] }
 0x1ac   : > { %1164 = vperm.xlu2 %1797, %v1041_v11   ;;  %1089 = vperm.xlu1 %1799, %v1016_v8  }
 0x1ad   : > { %811 = vmatpush.msrb.mxu1 %v2161_v3  ;;  %1734 = vmatpush.msrb.mxu3 %v2199_v10  ;;  %v1040_v3 = vadd.f32 %v2346_v56, %v974_v43 }
 0x1af   : > { %812 = vmatpush.msrb.mxu1 %v2169_v5  ;;  %1736 = vmatpush.msrb.mxu3 %v2208_v12  ;;  %v757_v5 = vld [vmem:[%s2135_s19] sm:$0xff] }
 0x1b1   : > { %813 = vmatpush.msrb.mxu1 %v2185_v7  ;;  %1738 = vmatpush.msrb.mxu3 %v2214_v14  ;;  %v1024_v7 = vadd.f32 %v2299_v15, %v2338_v45 }
 0x1b2   : > { %1711 = vmatmul.msk.f32.vlgmr.msrb.gmra.mxu3 %vm777_vm1, %v763_v1 }
 0x1b3   : > { %814 = vmatpush.msrb.mxu1 %v2192_v9  ;;  %v758_v9 = vld [vmem:[%s2135_s19 + $0x8] sm:$0xff]  ;;  %s1965_s19 = smov 64  }
 0x1b4   : > { %1161 = vperm.xlu1 %1799, %v1040_v3  }
 0x1b5   : > { %815 = vmatpush.msrb.mxu1 %v2199_v10  ;;  %v1032_v10 = vadd.f32 %v2313_v22, %v2340_v47 }
 0x1b7   : > { %816 = vmatpush.msrb.mxu1 %v2208_v12 }
 0x1b9   : > { %817 = vmatpush.msrb.mxu1 %v2214_v14 }
 0x1ba   : > { %1705 = vmatmul.msk.f32.vlgmr.msrb.gmra.mxu1 %vm777_vm1, %v757_v5  ;;  %1712 = vmatmul.msk.f32.gmra.mxu3 %vm777_vm1, %v764_v13 }
 0x1bc   : > { %1113 = vperm.xlu1 %1799, %v1024_v7  }
 0x1c2   : > { %1706 = vmatmul.msk.f32.gmra.mxu1 %vm777_vm1, %v758_v9 }
 0x1c4   : > { %1137 = vperm.xlu1 %1799, %v1032_v10  }
 0x1d1   : > { %v944_v12 = vpop.xlane.xlu1 %943 }
 0x1d2   : > { %v1033_v16 = vadd.f32 %v2313_v22, %v944_v12 }
 0x1d4   : > { %1140 = vperm.xlu0 %1798, %v1033_v16   ;;  %v2445_v16 = vpop.permute.xlu0 %1086 }
 0x206   : > { %v2430_v1 = vpop.permute.xlu1 %1155 }
 0x20e   : > { %v2435_v13 = vpop.permute.xlu1 %1107 }
 0x216   : > { %v2439_v10 = vpop.permute.xlu1 %1131 }
 0x21e   : > { %v2443_v12 = vpop.permute.xlu1 %1089 }
 0x225   : > { %v2395_v14 = vpop.f32.mrf.mxu3 }
 0x227   : > { %v2397_v17 = vpop.f32.mrf.mxu1 }
 0x235   : > { %v837_v18 = vpop.f32.mrf.mxu3 }
 0x236   : > { %v838_v23 = vadd.f32 %v2254_v25, %v837_v18 }
 0x237   : > { %v819_v20 = vpop.f32.mrf.mxu1 }
 0x238   : > { %v820_v21 = vadd.f32 %v2254_v25, %v819_v20  ;;  %v849_v28 = vmax.f32 %v838_v23, 0.0  ;;  %v2451_v20 = vpop.permute.xlu0 %1092 }
 0x23a   : > { %v843_v27 = vmax.f32 %v820_v21, 0.0  ;;  %v859_v40 = vmul.f32 %v2265_v35, %v849_v28  ;;  %v892_v50 = vmul.f32 %v2274_v44, %v849_v28  ;;  %v925_v0 = vmul.f32 %v2260_v29, %v849_v28 }
 0x23c   : > { %v952_v32 = vmul.f32 %v2269_v39, %v843_v27  ;;  %v853_v33 = vmul.f32 %v2265_v35, %v843_v27  ;;  %v886_v42 = vmul.f32 %v2274_v44, %v843_v27  ;;  %v879_v43 = vsel %vm562_vm0, %v859_v40, 0.0 }
 0x23d   : > { %v840_v46 = vpop.f32.mrf.mxu3  ;;  %v919_v52 = vmul.f32 %v2260_v29, %v843_v27  ;;  %v912_v57 = vsel %vm562_vm0, %v892_v50, 0.0  ;;  %v945_v4 = vsel %vm562_vm0, %v925_v0, 0.0 }
 0x23e   : > { %v960_v34 = vsel %vm562_vm0, %v952_v32, 0.0  ;;  %v861_v36 = vsel %vm562_vm0, %v853_v33, 0.0  ;;  %v894_v48 = vsel %vm562_vm0, %v886_v42, 0.0  ;;  %v841_v49 = vadd.f32 %v2254_v25, %v840_v46 }
 0x23f   : > { %v822_v37 = vpop.f32.mrf.mxu1  ;;  %961 = vadd.xlane.f32.xlu0 %v960_v34  ;;  %862 = vadd.xlane.f32.xlu1 %v861_v36  ;;  %v927_v59 = vsel %vm562_vm0, %v919_v52, 0.0 }
 0x240   : > { %v823_v38 = vadd.f32 %v2254_v25, %v822_v37  ;;  %v850_v55 = vmax.f32 %v841_v49, 0.0  ;;  %v958_v25 = vmul.f32 %v2269_v39, %v849_v28  ;;  %v2457_v23 = vpop.permute.xlu0 %1116 }
 0x242   : > { %v844_v41 = vmax.f32 %v823_v38, 0.0  ;;  %v893_v60 = vmul.f32 %v2274_v44, %v850_v55  ;;  %v978_v62 = vsel %vm562_vm0, %v958_v25, 0.0  ;;  %v926_v63 = vmul.f32 %v2260_v29, %v850_v55 }
 0x243   : > { %v959_v7 = vmul.f32 %v2269_v39, %v850_v55 }
 0x244   : > { %v854_v45 = vmul.f32 %v2265_v35, %v844_v41  ;;  %v920_v51 = vmul.f32 %v2260_v29, %v844_v41  ;;  %v915_v61 = vsel %vm562_vm0, %v893_v60, 0.0  ;;  %v948_v2 = vsel %vm562_vm0, %v926_v63, 0.0 }
 0x245   : > { %v953_v6 = vmul.f32 %v2269_v39, %v844_v41  ;;  %v887_v11 = vmul.f32 %v2274_v44, %v844_v41  ;;  %v860_v29 = vmul.f32 %v2265_v35, %v850_v55  ;;  %v981_v9 = vsel %vm562_vm0, %v959_v7, 0.0  ;;  %v2441_v44 = vpop.permute.xlu2 %1083  ;;  %v2449_v35 = vpop.permute.xlu1 %1161 }
 0x246   : > { %v864_v47 = vsel %vm562_vm0, %v854_v45, 0.0  ;;  %v930_v58 = vsel %vm562_vm0, %v920_v51, 0.0 }
 0x247   : > { %880 = vadd.xlane.f32.xlu0 %v879_v43  ;;  %865 = vadd.xlane.f32.xlu2 %v864_v47  ;;  %v963_v8 = vsel %vm562_vm0, %v953_v6, 0.0  ;;  %v897_v3 = vsel %vm562_vm0, %v887_v11, 0.0  ;;  %v882_v5 = vsel %vm562_vm0, %v860_v29, 0.0  ;;  %v700_v11 = vmul.f32 0.35355338, %v2397_v17 }
 0x248   : > { %895 = vadd.xlane.f32.xlu1 %v894_v48  ;;  %v2463_v32 = vpop.permute.xlu0 %1140 }
 0x249   : > { %v706_v29 = vsel %vm548_vm3, %v700_v11, -inf }
 0x24d   : > { %v2447_v18 = vpop.permute.xlu2 %1158  ;;  %v2455_v39 = vpop.permute.xlu1 %1113 }
 0x24f   : > { %913 = vadd.xlane.f32.xlu0 %v912_v57  ;;  %931 = vadd.xlane.f32.xlu2 %v930_v58 }
 0x250   : > { %928 = vadd.xlane.f32.xlu1 %v927_v59 }
 0x255   : > { %v2453_v21 = vpop.permute.xlu2 %1110  ;;  %v2461_v28 = vpop.permute.xlu1 %1137 }
 0x257   : > { %916 = vadd.xlane.f32.xlu0 %v915_v61 }
 0x258   : > { %979 = vadd.xlane.f32.xlu1 %v978_v62 }
 0x25d   : > { %v2459_v27 = vpop.permute.xlu2 %1134 }
 0x25f   : > { %949 = vadd.xlane.f32.xlu0 %v948_v2 }
 0x260   : > { %946 = vadd.xlane.f32.xlu1 %v945_v4 }
 0x265   : > { %v2465_v33 = vpop.permute.xlu2 %1164 }
 0x268   : > { %964 = vadd.xlane.f32.xlu1 %v963_v8 }
 0x270   : > { %898 = vadd.xlane.f32.xlu1 %v897_v3 }
 0x278   : > { %883 = vadd.xlane.f32.xlu1 %v882_v5 }
 0x280   : > { %982 = vadd.xlane.f32.xlu1 %v981_v9 }
 0x2b2   : > { %v863_v34 = vpop.xlane.xlu1 %862  ;;  %v962_v36 = vpop.xlane.xlu0 %961 }
 0x2b3   : > { %v1012_v37 = vadd.f32 %v2284_v54, %v863_v34  ;;  %v1036_v41 = vadd.f32 %v2346_v56, %v962_v36 }
 0x2b5   : > { %1077 = vperm.xlu1 %1799, %v1012_v37  }
 0x2ba   : > { %v866_v38 = vpop.xlane.xlu2 %865  ;;  %v881_v40 = vpop.xlane.xlu0 %880 }
 0x2bb   : > { %v1013_v42 = vadd.f32 %v2284_v54, %v866_v38  ;;  %v896_v43 = vpop.xlane.xlu1 %895  ;;  %v1018_v48 = vadd.f32 %v2284_v54, %v881_v40 }
 0x2bc   : > { %v1020_v45 = vadd.f32 %v2299_v15, %v896_v43  ;;  %v1172_v43 = vlaneseq }
 0x2bd   : > { %1080 = vperm.xlu0 %1798, %v1013_v42   ;;  %1149 = vperm.xlu1 %1799, %v1036_v41  }
 0x2be   : > { %1101 = vperm.xlu2 %1797, %v1020_v45  }
 0x2c2   : > { %v932_v46 = vpop.xlane.xlu2 %931  ;;  %v914_v47 = vpop.xlane.xlu0 %913 }
 0x2c3   : > { %v1029_v49 = vadd.f32 %v2313_v22, %v932_v46  ;;  %v929_v50 = vpop.xlane.xlu1 %928  ;;  %v1026_v57 = vadd.f32 %v2299_v15, %v914_v47  ;;  %v2512_v46 = vand.u32 127, %v1172_v43 }
 0x2c4   : > { %v1028_v51 = vadd.f32 %v2313_v22, %v929_v50 }
 0x2c5   : > { %1128 = vperm.xlu0 %1798, %v1029_v49   ;;  %1095 = vperm.xlu1 %1799, %v1018_v48   ;;  %v1201_v11 = vperm.slane %v2447_v18, %v2512_v46  ;;  %v1203_v43 = vperm.slane %v2465_v33, %v2512_v46 }
 0x2c6   : > { %1125 = vperm.xlu2 %1797, %v1028_v51   ;;  %v1176_v51 = vperm.slane %v2441_v44, %v2512_v46 }
 0x2ca   : > { %v917_v52 = vpop.xlane.xlu0 %916 }
 0x2cb   : > { %v980_v55 = vpop.xlane.xlu1 %979  ;;  %v1027_v4 = vadd.f32 %v2299_v15, %v917_v52  ;;  %v1177_v52 = vperm.slane %v2445_v16, %v2512_v46 }
 0x2cc   : > { %v1042_v58 = vadd.f32 %v2346_v56, %v980_v55 }
 0x2ce   : > { %1167 = vperm.xlu1 %1799, %v1042_v58   ;;  %1119 = vperm.xlu2 %1797, %v1026_v57   ;;  %v1178_v57 = vperm.slane %v2443_v12, %v2512_v46  ;;  %v1192_v12 = vperm.slane %v2439_v10, %v2512_v46  ;;  %v1202_v10 = vperm.slane %v2449_v35, %v2512_v46 }
 0x2d2   : > { %v950_v59 = vpop.xlane.xlu0 %949 }
 0x2d3   : > { %v947_v60 = vpop.xlane.xlu1 %946  ;;  %v1035_v25 = vadd.f32 %v2313_v22, %v950_v59  ;;  %v1179_v59 = vperm.slane %v2451_v20, %v2512_v46 }
 0x2d5   : > { %1146 = vperm.xlu0 %1798, %v1035_v25  }
 0x2db   : > { %v965_v61 = vpop.xlane.xlu1 %964 }
 0x2dc   : > { %v1037_v62 = vadd.f32 %v2346_v56, %v965_v61 }
 0x2de   : > { %1152 = vperm.xlu2 %1797, %v1037_v62  }
 0x2e3   : > { %v899_v63 = vpop.xlane.xlu1 %898 }
 0x2e4   : > { %v1021_v0 = vadd.f32 %v2299_v15, %v899_v63  ;;  %v2489_v15 = vsel %vm553_vm4, 0.0, %v706_v29 }
 0x2e5   : > { %v722_v17 = vsel %vm549_vm2, %v2489_v15, -inf }
 0x2e6   : > { %1104 = vperm.xlu1 %1799, %v1021_v0  }
 0x2eb   : > { %v884_v2 = vpop.xlane.xlu1 %883 }
 0x2ec   : > { %v1019_v6 = vadd.f32 %v2284_v54, %v884_v2  ;;  %v1034_v54 = vadd.f32 %v2313_v22, %v947_v60 }
 0x2ee   : > { %1098 = vperm.xlu2 %1797, %v1019_v6   ;;  %1122 = vperm.xlu1 %1799, %v1027_v4   ;;  %v1193_v4 = vperm.slane %v2459_v27, %v2512_v46  ;;  %v1200_v6 = vperm.slane %v2430_v1, %v2512_v46 }
 0x2f3   : > { %v983_v8 = vpop.xlane.xlu1 %982 }
 0x2f4   : > { %v1043_v3 = vadd.f32 %v2346_v56, %v983_v8  ;;  %v616_v56 = vpop.f32.mrf.mxu0 }
 0x2f5   : > { %v697_v5 = vmul.f32 0.35355338, %v616_v56 }
 0x2f6   : > { %1170 = vperm.xlu2 %1797, %v1043_v3  }
 0x2f7   : > { %v703_v7 = vsel %vm548_vm3, %v697_v5, -inf }
 0x2f8   : > { %v2498_v34 = vsel %vm553_vm4, 0.0, %v703_v7 }
 0x2f9   : > { %v713_v37 = vsel %vm549_vm2, %v2498_v34, -inf }
 0x2fc   : > { %v642_v9 = vpop.f32.mrf.mxu0 }
 0x2fd   : > { %v698_v36 = vmul.f32 0.35355338, %v642_v9 }
 0x2fe   : > { %1143 = vperm.xlu2 %1797, %v1034_v54  }
 0x2ff   : > { %723 = vmax.xlane.f32.xlu0 %v722_v17  ;;  %v704_v22 = vsel %vm548_vm3, %v698_v36, -inf }
 0x300   : > { %v2508_v40 = vsel %vm553_vm4, 0.0, %v704_v22 }
 0x301   : > { %v716_v41 = vsel %vm549_vm2, %v2508_v40, -inf }
 0x318   : > { %714 = vmax.xlane.f32.xlu1 %v713_v37  ;;  %v2504_v38 = vpop.permute.xlu2 %1101 }
 0x320   : > { %717 = vmax.xlane.f32.xlu1 %v716_v41  ;;  %v1126_v42 = vpop.permute.xlu2 %1125 }
 0x321   : > { %v1190_v62 = vperm.slane %v1126_v42, %v2512_v46 }
 0x327   : > { %v1078_v45 = vpop.permute.xlu1 %1077 }
 0x328   : > { %v1174_v48 = vperm.slane %v1078_v45, %v2512_v46  ;;  %v2515_v49 = vpop.permute.xlu2 %1119 }
 0x32f   : > { %v1081_v47 = vpop.permute.xlu0 %1080  ;;  %v1150_v25 = vpop.permute.xlu1 %1149 }
 0x330   : > { %v1175_v50 = vperm.slane %v1081_v47, %v2512_v46  ;;  %v1198_v2 = vperm.slane %v1150_v25, %v2512_v46 }
 0x332   : > { %v1207_v55 = vsel %vm1206_vm5, %v1175_v50, %v1174_v48 }
 0x333   : > { %v1209_v58 = vsel %vm1208_vm6, %v1176_v51, %v1207_v55 }
 0x334   : > { %v1211_v60 = vsel %vm1210_vm7, %v1177_v52, %v1209_v58  ;;  %v699_v52 = vmul.f32 0.35355338, %v2395_v14  ;;  %v1195_v14 = vperm.slane %v2463_v32, %v2512_v46  ;;  %v1185_v32 = vperm.slane %v2453_v21, %v2512_v46 }
 0x335   : > { %v1213_v44 = vsel %vm1212_vm8, %v1178_v57, %v1211_v60  ;;  %v1194_v57 = vperm.slane %v2461_v28, %v2512_v46  ;;  %v1182_v28 = vperm.slane %v2504_v38, %v2512_v46 }
 0x336   : > { %v1215_v61 = vsel %vm1214_vm9, %v1179_v59, %v1213_v44 }
 0x337   : > { %v1129_v16 = vpop.permute.xlu0 %1128  ;;  %v1096_v56 = vpop.permute.xlu1 %1095 }
 0x338   : > { %v1153_v63 = vpop.permute.xlu2 %1152  ;;  %v1191_v0 = vperm.slane %v1129_v16, %v2512_v46  ;;  %v1180_v5 = vperm.slane %v1096_v56, %v2512_v46 }
 0x339   : > { %v1199_v20 = vperm.slane %v1153_v63, %v2512_v46  ;;  %v1184_v63 = vperm.slane %v2435_v13, %v2512_v46 }
 0x33a   : > { %v1227_v8 = vsel %vm1206_vm5, %v1191_v0, %v1190_v62  ;;  %v1217_v9 = vsel %vm1216_vm10, %v1180_v5, %v1215_v61  ;;  %v705_v61 = vsel %vm548_vm3, %v699_v52, -inf }
 0x33b   : > { %v1234_v3 = vsel %vm1206_vm5, %v1199_v20, %v1198_v2  ;;  %v1228_v29 = vsel %vm1208_vm6, %v1192_v12, %v1227_v8  ;;  %v711_v38 = vsel %vm553_vm4, 0.0, %v705_v61  ;;  %v1187_v8 = vperm.slane %v2457_v23, %v2512_v46 }
 0x33c   : > { %v1235_v54 = vsel %vm1208_vm6, %v1200_v6, %v1234_v3  ;;  %v1229_v17 = vsel %vm1210_vm7, %v1193_v4, %v1228_v29  ;;  %v1186_v4 = vperm.slane %v2455_v39, %v2512_v46  ;;  %v719_v3 = vsel %vm549_vm2, %v711_v38, -inf }
 0x33d   : > { %v1236_v27 = vsel %vm1210_vm7, %v1201_v11, %v1235_v54  ;;  %v1230_v60 = vsel %vm1212_vm8, %v1194_v57, %v1229_v17  ;;  %v1188_v23 = vperm.slane %v2515_v49, %v2512_v46 }
 0x33e   : > { %v1237_v1 = vsel %vm1212_vm8, %v1202_v10, %v1236_v27  ;;  %v1231_v12 = vsel %vm1214_vm9, %v1195_v14, %v1230_v60 }
 0x33f   : > { %v1238_v47 = vsel %vm1214_vm9, %v1203_v43, %v1237_v1 }
 0x340   : > { %v1168_v36 = vpop.permute.xlu1 %1167 }
 0x341   : > { %v1204_v41 = vperm.slane %v1168_v36, %v2512_v46 }
 0x343   : > { %v1239_v50 = vsel %vm1216_vm10, %v1204_v41, %v1238_v47 }
 0x347   : > { %v1147_v59 = vpop.permute.xlu0 %1146 }
 0x348   : > { %v1099_v18 = vpop.permute.xlu2 %1098  ;;  %v1197_v0 = vperm.slane %v1147_v59, %v2512_v46 }
 0x349   : > { %v1181_v7 = vperm.slane %v1099_v18, %v2512_v46 }
 0x34b   : > { %v1219_v35 = vsel %vm1218_vm11, %v1181_v7, %v1217_v9 }
 0x34c   : > { %v1245_v37 = vsel %vm548_vm3, %v1219_v35, -inf }
 0x34d   : > { %v2560_v22 = vsel %vm553_vm4, 0.0, %v1245_v37 }
 0x34e   : > { %v1253_v42 = vsel %vm549_vm2, %v2560_v22, -inf }
 0x34f   : > { %1254 = vmax.xlane.f32.xlu2 %v1253_v42 }
 0x350   : > { %v1171_v45 = vpop.permute.xlu2 %1170 }
 0x351   : > { %v1205_v48 = vperm.slane %v1171_v45, %v2512_v46 }
 0x353   : > { %v1240_v51 = vsel %vm1218_vm11, %v1205_v48, %v1239_v50 }
 0x354   : > { %v1248_v55 = vsel %vm548_vm3, %v1240_v51, -inf }
 0x355   : > { %v2578_v33 = vsel %vm553_vm4, 0.0, %v1248_v55 }
 0x356   : > { %v1262_v58 = vsel %vm549_vm2, %v2578_v33, -inf }
 0x357   : > { %1263 = vmax.xlane.f32.xlu2 %v1262_v58 }
 0x358   : > { %v1105_v44 = vpop.permute.xlu1 %1104  ;;  %v1144_v25 = vpop.permute.xlu2 %1143 }
 0x359   : > { %v1183_v16 = vperm.slane %v1105_v44, %v2512_v46  ;;  %v1196_v62 = vperm.slane %v1144_v25, %v2512_v46 }
 0x35b   : > { %v1220_v2 = vsel %vm1206_vm5, %v1183_v16, %v1182_v28  ;;  %v1232_v20 = vsel %vm1216_vm10, %v1196_v62, %v1231_v12 }
 0x35c   : > { %v1221_v6 = vsel %vm1208_vm6, %v1184_v63, %v1220_v2  ;;  %v1233_v13 = vsel %vm1218_vm11, %v1197_v0, %v1232_v20 }
 0x35d   : > { %v1222_v11 = vsel %vm1210_vm7, %v1185_v32, %v1221_v6  ;;  %v1247_v21 = vsel %vm548_vm3, %v1233_v13, -inf }
 0x35e   : > { %v1251_v29 = vsel %vm553_vm4, 0.0, %v1247_v21  ;;  %v1223_v10 = vsel %vm1212_vm8, %v1186_v4, %v1222_v11 }
 0x35f   : > { %720 = vmax.xlane.f32.xlu2 %v719_v3  ;;  %v1259_v39 = vsel %vm549_vm2, %v1251_v29, -inf  ;;  %v1224_v54 = vsel %vm1214_vm9, %v1187_v8, %v1223_v10 }
 0x360   : > { %v1123_v17 = vpop.permute.xlu1 %1122  ;;  %1260 = vmax.xlane.f32.xlu1 %v1259_v39  ;;  %v1225_v1 = vsel %vm1216_vm10, %v1188_v23, %v1224_v54 }
 0x361   : > { %v1189_v27 = vperm.slane %v1123_v17, %v2512_v46 }
 0x363   : > { %v1226_v56 = vsel %vm1218_vm11, %v1189_v27, %v1225_v1 }
 0x364   : > { %v1246_v5 = vsel %vm548_vm3, %v1226_v56, -inf }
 0x365   : > { %v1250_v18 = vsel %vm553_vm4, 0.0, %v1246_v5 }
 0x366   : > { %v1256_v7 = vsel %vm549_vm2, %v1250_v18, -inf }
 0x367   : > { %1257 = vmax.xlane.f32.xlu0 %v1256_v7 }
 0x372   : > { %v724_v9 = vpop.xlane.xlu0 %723 }
 0x373   : > { %v728_v49 = vsub.f32 %v2489_v15, %v724_v9 }
 0x375   : > { %v735_v36 = vmul.f32 1.442695, %v728_v49 }
 0x377   : > { %1815 = vpow2.f32 %v735_v36 }
 0x37d   : > { %v2627_v35 = vpop.eup %1815 }
 0x37e   : > { %v746_v46 = vsel %vm549_vm2, %v2627_v35, 0.0 }
 0x37f   : > { %747 = vadd.xlane.f32.xlu1 %v746_v46 }
 0x38b   : > { %v715_v37 = vpop.xlane.xlu1 %714 }
 0x38c   : > { %v725_v19 = vsub.f32 %v2498_v34, %v715_v37 }
 0x38e   : > { %v729_v41 = vmul.f32 1.442695, %v725_v19 }
 0x390   : > { %1817 = vpow2.f32 %v729_v41 }
 0x393   : > { %v718_v43 = vpop.xlane.xlu1 %717 }
 0x394   : > { %v726_v47 = vsub.f32 %v2508_v40, %v718_v43 }
 0x396   : > { %v1818_v53 = vpop.eup %1817  ;;  %v731_v50 = vmul.f32 1.442695, %v726_v47 }
 0x397   : > { %v737_v42 = vsel %vm549_vm2, %v1818_v53, 0.0 }
 0x398   : > { %738 = vadd.xlane.f32.xlu0 %v737_v42 }
 0x3c2   : > { %v1255_v45 = vpop.xlane.xlu2 %1254 }
 0x3c3   : > { %v1265_v15 = vsub.f32 %v2560_v22, %v1255_v45 }
 0x3c5   : > { %v1269_v48 = vmul.f32 1.442695, %v1265_v15  ;;  %v1800_v15 = vpack.i.bf16 %v2316_v26, %v2330_v31 }
 0x3c7   : > { %1819 = vpow2.f32 %v1269_v48 }
 0x3c8   : > { %1821 = vpow2.f32 %v731_v50 }
 0x3ca   : > { %v1264_v51 = vpop.xlane.xlu2 %1263 }
 0x3cb   : > { %v1268_v52 = vsub.f32 %v2578_v33, %v1264_v51 }
 0x3cd   : > { %v1820_v55 = vpop.eup %1819  ;;  %v1275_v34 = vmul.f32 1.442695, %v1268_v52 }
 0x3ce   : > { %v1277_v57 = vsel %vm549_vm2, %v1820_v55, 0.0  ;;  %v2637_v59 = vpop.eup %1821 }
 0x3cf   : > { %1823 = vpow2.f32 %v1275_v34  ;;  %1278 = vadd.xlane.f32.xlu2 %v1277_v57  ;;  %v740_v61 = vsel %vm549_vm2, %v2637_v59, 0.0 }
 0x3d2   : > { %v721_v58 = vpop.xlane.xlu2 %720 }
 0x3d3   : > { %v727_v60 = vsub.f32 %v711_v38, %v721_v58  ;;  %v1261_v22 = vpop.xlane.xlu1 %1260 }
 0x3d4   : > { %v1267_v14 = vsub.f32 %v1251_v29, %v1261_v22 }
 0x3d5   : > { %v1824_v40 = vpop.eup %1823  ;;  %v733_v44 = vmul.f32 1.442695, %v727_v60 }
 0x3d6   : > { %v1273_v25 = vmul.f32 1.442695, %v1267_v14  ;;  %v1286_v33 = vsel %vm549_vm2, %v1824_v40, 0.0 }
 0x3d7   : > { %1825 = vpow2.f32 %v733_v44  ;;  %741 = vadd.xlane.f32.xlu2 %v740_v61  ;;  %1287 = vadd.xlane.f32.xlu0 %v1286_v33 }
 0x3d8   : > { %1827 = vpow2.f32 %v1273_v25 }
 0x3da   : > { %v1258_v28 = vpop.xlane.xlu0 %1257 }
 0x3db   : > { %v1266_v16 = vsub.f32 %v1250_v18, %v1258_v28 }
 0x3dd   : > { %v1826_v62 = vpop.eup %1825  ;;  %v1271_v63 = vmul.f32 1.442695, %v1266_v16 }
 0x3de   : > { %v1828_v0 = vpop.eup %1827  ;;  %v743_v12 = vsel %vm549_vm2, %v1826_v62, 0.0 }
 0x3df   : > { %1829 = vpow2.f32 %v1271_v63  ;;  %744 = vadd.xlane.f32.xlu0 %v743_v12  ;;  %v1283_v32 = vsel %vm549_vm2, %v1828_v0, 0.0 }
 0x3e0   : > { %1284 = vadd.xlane.f32.xlu2 %v1283_v32 }
 0x3e5   : > { %v1830_v2 = vpop.eup %1829 }
 0x3e6   : > { %v1280_v20 = vsel %vm549_vm2, %v1830_v2, 0.0 }
 0x3e7   : > { %1281 = vadd.xlane.f32.xlu1 %v1280_v20 }
 0x3f2   : > { %v748_v13 = vpop.xlane.xlu1 %747 }
 0x40b   : > { %v739_v38 = vpop.xlane.xlu0 %738 }
 0x40c   : > { %1831 = vrcp.f32 %v739_v38 }
 0x412   : > { %v1832_v6 = vpop.eup %1831 }
 0x413   : > { %v753_v3 = vmul.f32 %v1832_v6, %v1818_v53 }
 0x442   : > { %v1279_v4 = vpop.xlane.xlu2 %1278 }
 0x443   : > { %1833 = vrcp.f32 %v1279_v4 }
 0x444   : > { %1835 = vrcp.f32 %v748_v13 }
 0x449   : > { %v1834_v8 = vpop.eup %1833 }
 0x44a   : > { %v742_v11 = vpop.xlane.xlu2 %741  ;;  %v1288_v21 = vpop.xlane.xlu0 %1287  ;;  %v1293_v29 = vmul.f32 %v1834_v8, %v1820_v55 }
 0x44b   : > { %1837 = vrcp.f32 %v1288_v21  ;;  %v1836_v54 = vpop.eup %1835 }
 0x44c   : > { %v2645_v10 = vadd.f32 %v1293_v29, %v753_v3  ;;  %v756_v1 = vmul.f32 %v1836_v54, %v2627_v35 }
 0x44e   : > { %v1301_v39 = vsel %vm549_vm2, %v2645_v10, 0.0 }
 0x44f   : > { %1302 = vadd.xlane.f32.xlu1 %v1301_v39 }
 0x451   : > { %v1838_v23 = vpop.eup %1837 }
 0x452   : > { %v745_v17 = vpop.xlane.xlu0 %744  ;;  %v1296_v56 = vmul.f32 %v1838_v23, %v1824_v40 }
 0x453   : > { %1839 = vrcp.f32 %v745_v17  ;;  %v1285_v27 = vpop.xlane.xlu2 %1284 }
 0x454   : > { %1841 = vrcp.f32 %v1285_v27  ;;  %v2650_v5 = vadd.f32 %v1296_v56, %v756_v1 }
 0x455   : > { %1843 = vrcp.f32 %v742_v11 }
 0x456   : > { %v1310_v18 = vsel %vm549_vm2, %v2650_v5, 0.0 }
 0x457   : > { %1311 = vadd.xlane.f32.xlu0 %v1310_v18 }
 0x459   : > { %v1840_v7 = vpop.eup %1839 }
 0x45a   : > { %v1842_v9 = vpop.eup %1841  ;;  %v1282_v49 = vpop.xlane.xlu1 %1281  ;;  %v755_v36 = vmul.f32 %v1840_v7, %v1826_v62 }
 0x45b   : > { %1845 = vrcp.f32 %v1282_v49  ;;  %v1295_v46 = vmul.f32 %v1842_v9, %v1828_v0  ;;  %v1844_v19 = vpop.eup %1843 }
 0x45c   : > { %v754_v53 = vmul.f32 %v1844_v19, %v2637_v59 }
 0x45d   : > { %v2654_v37 = vadd.f32 %v1295_v46, %v755_v36 }
 0x45f   : > { %v1307_v35 = vsel %vm549_vm2, %v2654_v37, 0.0 }
 0x460   : > { %1308 = vadd.xlane.f32.xlu1 %v1307_v35 }
 0x461   : > { %v1846_v41 = vpop.eup %1845 }
 0x462   : > { %v1294_v42 = vmul.f32 %v1846_v41, %v1830_v2  ;;  %v1496_v41 = vld [vmem:[%s2746_s10 + $0x10] sm:$0xff] }
 0x464   : > { %v2659_v43 = vadd.f32 %v1294_v42, %v754_v53  ;;  %v1495_v53 = vld [vmem:[%s2746_s10 + $0x8] sm:$0xff]  ;;  %v1494_v42 = vld [vmem:[%s2746_s10] sm:$0xff] }
 0x466   : > { %v1304_v45 = vsel %vm549_vm2, %v2659_v43, 0.0 }
 0x467   : > { %1305 = vadd.xlane.f32.xlu2 %v1304_v45 }
 0x46b   : > { %1373 = vrot.lane.b32.xlu0 %v2244_v24, %s1965_s19 }
 0x479   : > { %1425 = vrot.lane.b32.xlu1 %v2326_v30, %s1965_s19 }
 0x47f   : > { %1801 = vrot.lane.b32.xlu2 %v1800_v15, %s1965_s19 }
 0x4c2   : > { %v1303_v47 = vpop.xlane.xlu1 %1302 }
 0x4c3   : > { %1847 = vrcp.f32 %v1303_v47  ;;  %v1324_v24 = vand.u32 2147483648, %v1303_v47  ;;  %vm1318_vm13 = vweird.f32 %v1303_v47  ;;  %v1322_v60 = vand.u32 2147483647, %v1303_v47 }
 0x4c5   : > { %v1325_v22 = vor.u32 1.1754944e-38, %v1324_v24  ;;  %vm1323_vm15 = vcmp.eq.f32.partialorder %v1322_v60, 8.507059e+37 }
 0x4c9   : > { %v1848_v48 = vpop.eup %1847 }
 0x4ca   : > { %v1314_v50 = vmul.f32 %v1848_v48, %v1303_v47  ;;  %v1312_v51 = vpop.xlane.xlu0 %1311  ;;  %vm1319_vm12 = vweird.f32 %v1848_v48 }
 0x4cb   : > { %1849 = vrcp.f32 %v1312_v51  ;;  %vm1320_vm14 = vmor %vm1318_vm13, %vm1319_vm12  ;;  %v1369_v33 = vand.u32 2147483648, %v1312_v51  ;;  %vm1363_vm3 = vweird.f32 %v1312_v51  ;;  %v1367_v16 = vand.u32 2147483647, %v1312_v51 }
 0x4cc   : > { %v1315_v52 = vsub.f32 1.0, %v1314_v50 }
 0x4cd   : > { %v1370_v2 = vor.u32 1.1754944e-38, %v1369_v33  ;;  %vm1368_vm6 = vcmp.eq.f32.partialorder %v1367_v16, 8.507059e+37 }
 0x4ce   : > { %v1316_v55 = vmul.f32 %v1848_v48, %v1315_v52 }
 0x4d0   : > { %v1317_v59 = vadd.f32 %v1848_v48, %v1316_v55 }
 0x4d1   : > { %v1850_v34 = vpop.eup %1849 }
 0x4d2   : > { %v1359_v57 = vmul.f32 %v1850_v34, %v1312_v51  ;;  %v1321_v26 = vsel %vm1320_vm14, %v1848_v48, %v1317_v59  ;;  %vm1364_vm1 = vweird.f32 %v1850_v34  ;;  %vm1490_vm14 = vcmask 130048   ;;  %v1812_v51 = vld [vmem:[%s2747_s11] ss:$0 sm:$0xff] }
 0x4d3   : > { %v1309_v58 = vpop.xlane.xlu1 %1308  ;;  %v1326_v44 = vsel %vm1323_vm15, %v1325_v22, %v1321_v26  ;;  %vm1365_vm4 = vmor %vm1363_vm3, %vm1364_vm1  ;;  %vm1492_vm15 = vcmask 195584   ;;  %v1969_v59 = vmov 32.0  }
 0x4d4   : > { %1851 = vrcp.f32 %v1309_v58  ;;  %v1360_v30 = vsub.f32 1.0, %v1359_v57  ;;  %v1327_v63 = vmul.f32 %v1326_v44, %v2645_v10  ;;  %v1354_v38 = vand.u32 2147483648, %v1309_v58 }
 0x4d5   : > { %vm1348_vm7 = vweird.f32 %v1309_v58  ;;  %v1352_v8 = vand.u32 2147483647, %v1309_v58 }
 0x4d6   : > { %v1361_v31 = vmul.f32 %v1850_v34, %v1360_v30  ;;  %v1355_v10 = vor.u32 1.1754944e-38, %v1354_v38 }
 0x4d7   : > { %vm1353_vm10 = vcmp.eq.f32.partialorder %v1352_v8, 8.507059e+37 }
 0x4d8   : > { %v1362_v61 = vadd.f32 %v1850_v34, %v1361_v31 }
 0x4da   : > { %v1852_v14 = vpop.eup %1851  ;;  %v1306_v40 = vpop.xlane.xlu2 %1305  ;;  %v1366_v12 = vsel %vm1365_vm4, %v1850_v34, %v1362_v61  ;;  %v1859_v34 = vld [vmem:[%s2176_s23] sm:$0xff]  ;;  %s1693_s23 = sshll.u32 %s2131_s18, 3 }
 0x4db   : > { %v1344_v25 = vmul.f32 %v1852_v14, %v1309_v58  ;;  %1853 = vrcp.f32 %v1306_v40  ;;  %vm1349_vm5 = vweird.f32 %v1852_v14  ;;  %v1371_v13 = vsel %vm1368_vm6, %v1370_v2, %v1366_v12 }
 0x4dc   : > { %vm1350_vm8 = vmor %vm1348_vm7, %vm1349_vm5  ;;  %v1339_v39 = vand.u32 2147483648, %v1306_v40  ;;  %v1337_v23 = vand.u32 2147483647, %v1306_v40  ;;  %v1372_v17 = vmul.f32 %v1371_v13, %v2650_v5  ;;  %vm1333_vm11 = vweird.f32 %v1306_v40 }
 0x4dd   : > { %v1345_v28 = vsub.f32 1.0, %v1344_v25  ;;  %v1374_v62 = vpop.permute.xlu0 %1373  ;;  %1855 = vrcp.f32 %v1969_v59 }
 0x4de   : > { %1394 = vmatpush.msra.mxu3 %v1374_v62  ;;  %v1340_v56 = vor.u32 1.1754944e-38, %v1339_v39  ;;  %vm1338_vm13 = vcmp.eq.f32.partialorder %v1337_v23, 8.507059e+37 }
 0x4df   : > { %v1346_v0 = vmul.f32 %v1852_v14, %v1345_v28  ;;  %1713 = vmatmul.msk.f32.vlgmr.msra.gmra.mxu3 %vm549_vm2, %v1327_v63 }
 0x4e1   : > { %v1854_v32 = vpop.eup %1853  ;;  %v1347_v20 = vadd.f32 %v1852_v14, %v1346_v0 }
 0x4e2   : > { %v1329_v4 = vmul.f32 %v1854_v32, %v1306_v40  ;;  %v1802_v6 = vpop.permute.xlu2 %1801  ;;  %vm1334_vm9 = vweird.f32 %v1854_v32 }
 0x4e3   : > { %v1804_v11 = vunpack.i.h.bf16 %v1802_v6  ;;  %v1803_v21 = vunpack.i.l.bf16 %v1802_v6  ;;  %v1351_v29 = vsel %vm1350_vm8, %v1852_v14, %v1347_v20  ;;  %vm1335_vm12 = vmor %vm1333_vm11, %vm1334_vm9  ;;  %v1856_v24 = vpop.eup %1855  ;;  %v1813_v20 = vld [vmem:[%s2748_s12] ss:$0 sm:$0xff] }
 0x4e4   : > { %v1330_v3 = vsub.f32 1.0, %v1329_v4  ;;  %v1356_v27 = vsel %vm1353_vm10, %v1355_v10, %v1351_v29  ;;  %v1530_v30 = vmul.f32 32.0, %v1856_v24  ;;  %v1814_v6 = vld [vmem:[%s2774_s13] ss:$0 sm:$0xff] }
 0x4e5   : > { %1420 = vmatpush.msrb.mxu0 %v1804_v11  ;;  %1472 = vmatpush.msrb.mxu3 %v1803_v21  ;;  %v1357_v49 = vmul.f32 %v1356_v27, %v2654_v37  ;;  %v1497_v37 = vld [vmem:[%s2746_s10 + $0x18] sm:$0xff] }
 0x4e6   : > { %v1331_v54 = vmul.f32 %v1854_v32, %v1330_v3  ;;  %v1531_v60 = vsub.f32 1.0, %v1530_v30 }
 0x4e7   : > { %1716 = vmatmul.msk.f32.vlgmr.msrb.gmra.mxu3 %vm549_vm2, %v1372_v17  ;;  %1517 = vmatpush.msra.mxu0 %v1497_v37 }
 0x4e8   : > { %v1332_v1 = vadd.f32 %v1854_v32, %v1331_v54  ;;  %v1532_v26 = vmul.f32 %v1856_v24, %v1531_v60 }
 0x4e9   : > { %1518 = vmatpush.msra.mxu0 %v1496_v41 }
 0x4ea   : > { %v1336_v18 = vsel %vm1335_vm12, %v1854_v32, %v1332_v1  ;;  %v1533_v31 = vadd.f32 %v1856_v24, %v1532_v26 }
 0x4eb   : > { %v1341_v7 = vsel %vm1338_vm13, %v1340_v56, %v1336_v18  ;;  %v1426_v9 = vpop.permute.xlu1 %1425  ;;  %1519 = vmatpush.msra.mxu0 %v1495_v53 }
 0x4ec   : > { %1446 = vmatpush.msra.mxu1 %v1426_v9  ;;  %v1342_v36 = vmul.f32 %v1341_v7, %v2659_v43 }
 0x4ed   : > { %1715 = vmatmul.msk.f32.vlgmr.msra.gmra.mxu1 %vm549_vm2, %v1357_v49  ;;  %1520 = vmatpush.msra.mxu0 %v1494_v42 }
 0x4ee   : > { %1714 = vmatmul.msk.f32.vlgmr.msrb.gmra.mxu0 %vm549_vm2, %v1342_v36 }
 0x562   : > { %v1396_v5 = vpop.f32.mrf.mxu3 }
 0x56a   : > { %v1474_v46 = vpop.f32.mrf.mxu3  ;;  %v1448_v35 = vpop.f32.mrf.mxu1 }
 0x56b   : > { %v1422_v19 = vpop.f32.mrf.mxu0  ;;  %1486 = vrot.lane.b32.xlu2 %v1474_v46, %s1966_s25  ;;  %s1719_s25 = sshll.u32 %s2066_s17, 3  ;;  %s524_s17 = scalar_lea.vmem [#allocation5], %s1693_s23 }
 0x56c   : > { %1478 = vrot.lane.b32.xlu0 %v1422_v19, %s1967_s26  ;;  %s1577_s28 = scalar_lea.hbm %s2772_s22, %s1719_s25  ;;  %s1579_s20 = sshll.u32 %s524_s17, 4  ;;  %s1580_s20 = int_to_ptr.vmem [resolvable:$true] %s1579_s20 }
 0x56d   : > { %s1581_s19 = sshll.u32 %s1577_s28, 4  ;;  %s1567_s26 = scalar_lea.sflag [#allocation4], %s2131_s18  ;;  %s1582_s19 = int_to_ptr.hbm [resolvable:$true] %s1581_s19 }
 0x56e   : > { %s1910_s23 = scalar_lea.hbm %s2772_s22, 16 }
 0x574   : > { %1482 = vrot.lane.b32.xlu0 %v1448_v35, %s1968_s29  ;;  %s1904_s29 = sshra.s32 %s1582_s19, 4  ;;  %s1905_s29 = int_to_ptr.hbm [resolvable:$true] %s1904_s29 }
 0x575   : > { %s1906_s25 = scalar_lea.hbm %s1905_s29, 8  ;;  %p1911_p1 = scmp.lt.s32.totalorder %s1905_s29, %s2772_s22 }
 0x576   : > { %p1907_p6 = scmp.ne.s32.totalorder %s1905_s29, %s1906_s25  ;;  %p1912_p3 = scmp.lt.s32.totalorder %s1910_s23, %s1906_s25 }
 0x578   : > { %p1908_p13 = pnand %p1907_p6, %p2095_p11  ;;  %p1913_p4 = por %p1912_p3, %p1911_p1 }
 0x57a   : > { %p1909_p0 = pneg %p1908_p13 }
 0x57c   : > { %p1914_p7 = pnand %p1913_p4, %p1909_p0 }
 0x5c5   : > { %v1487_v47 = vpop.permute.xlu2 %1486 }
 0x5de   : > { %v1479_v43 = vpop.permute.xlu0 %1478 }
 0x5df   : > { %v1489_v45 = vsel %vm549_vm2, %v1396_v5, %v1479_v43  ;;  %vm1534_vm2 = vweird.f32 %v1856_v24 }
 0x5e0   : > { %v1535_v22 = vsel %vm1534_vm2, %v1856_v24, %v1533_v31 }
 0x5e6   : > { %v1483_v15 = vpop.permute.xlu0 %1482 }
 0x5e7   : > { %v1491_v48 = vsel %vm1490_vm14, %v1489_v45, %v1483_v15 }
 0x5e8   : > { %v1493_v50 = vsel %vm1492_vm15, %v1491_v48, %v1487_v47 }
 0x5e9   : > { %1717 = vmatmul.msk.f32.vlgmr.msra.gmra.mxu0 %vm562_vm0, %v1493_v50 }
 0x666   : > { %v1522_v52 = vpop.f32.mrf.mxu0 }
 0x667   : > { %v1523_v55 = vadd.f32 %v1812_v51, %v1522_v52 }
 0x669   : > { %v1525_v57 = vadd.f32 %v1859_v34, %v1523_v55 }
 0x66b   : > { %v1526_v58 = vsel %vm562_vm0, %v1525_v57, 0.0 }
 0x66c   : > { %1527 = vadd.xlane.f32.xlu1 %v1526_v58 }
 0x6df   : > { %v1528_v14 = vpop.xlane.xlu1 %1527 }
 0x6e0   : > { %v1536_v40 = vmul.f32 %v1535_v22, %v1528_v14 }
 0x6e2   : > { %v1537_v44 = vsub.f32 %v1525_v57, %v1536_v40 }
 0x6e4   : > { %v1538_v25 = vmul.f32 %v1537_v44, %v1537_v44 }
 0x6e6   : > { %v1539_v61 = vsel %vm562_vm0, %v1538_v25, 0.0 }
 0x6e7   : > { %1540 = vadd.xlane.f32.xlu0 %v1539_v61 }
 0x75a   : > { %v1541_v33 = vpop.xlane.xlu0 %1540 }
 0x75b   : > { %v1542_v28 = vmul.f32 %v1541_v33, %v1535_v22 }
 0x75d   : > { %v1543_v16 = vadd.f32 1e-05, %v1542_v28 }
 0x75f   : > { %1857 = vrsqrt.f32 %v1543_v16  ;;  %vm1550_vm3 = vweird.f32 %v1543_v16 }
 0x765   : > { %v1858_v62 = vpop.eup %1857 }
 0x766   : > { %v1545_v63 = vmul.f32 %v1858_v62, %v1543_v16  ;;  %vm1551_vm1 = vweird.f32 %v1858_v62 }
 0x767   : > { %vm1552_vm4 = vmor %vm1550_vm3, %vm1551_vm1 }
 0x768   : > { %v1546_v0 = vmul.f32 %v1858_v62, %v1545_v63 }
 0x76a   : > { %v1547_v12 = vmul.f32 0.5, %v1546_v0 }
 0x76c   : > { %v1548_v32 = vsub.f32 1.5, %v1547_v12 }
 0x76e   : > { %v1549_v2 = vmul.f32 %v1858_v62, %v1548_v32 }
 0x770   : > { %v1553_v38 = vsel %vm1552_vm4, %v1858_v62, %v1549_v2 }
 0x771   : > { %v1554_v4 = vmul.f32 %v1553_v38, %v1537_v44 }
 0x773   : > { %v1559_v13 = vmul.f32 %v1813_v20, %v1554_v4 }
 0x775   : > { %v1564_v8 = vadd.f32 %v1814_v6, %v1559_v13 }
 0x777   : > { %1565 = vst.msk [vmem:[%s524_s17] sm:$0xff] %vm562_vm0, %v1564_v8 }
 0x778   : > { %1917 = shalt.err (!%p1914_p7)
}
 0x779   : > { %1741 = dma.vmem_to_hbm [thread:$0]  (%p2095_p11), %s1580_s20, 128, %s1582_s19, %s1567_s26  }
 0x77a PF: > { %s2775_s18 = sld [smem:[#allocation8_spill]]  ;;  %p2777_p5 = scmp.ge.s32.totalorder %s1956_s16, 2 }
 0x77c   : > { %p1748_p8 = pnand %p2777_p5, %p2099_p12 }
 0x77e   : > { %p1749_p10 = pneg %p1748_p8 }
 0x780   : > { %s1593_s13 = sand.u32 1, %s2775_s18  }
 0x781   : > { %s1594_s17 = scalar_lea.sflag [#allocation4], %s1593_s13 }
 0x782   : > { %1939 = dma.done.wait (%p1749_p10), %s1594_s17, 128  }
 0x783   : > { %1941 = vsyncadd (%p1749_p10), %s1594_s17, 4294967168  ;;  %s2778_s16 = sld [smem:[#allocation10_spill]]  ;;  %s2781_s29 = smov %s1948_s30 }
 0x784   : > { %s2779_s25 = sld [smem:[#allocation9_spill]] }
 0x785   : > { %s2780_s15 = sld [smem:[#allocation11_spill]] }
 0x789   : > { %p27_p2 = scmp.ge.s32.totalorder %s2778_s16, 4  }
 0x78a   : > { %s2782_s30 = smov %s2779_s25 }
 0x78b   :  { %29 = sbr.rel (!%p27_p2) target bundleno = 8 (0x8), region = 130 }
 0x790   :  { %1600 = vsyncpa [#allocation3], 1 }
 0x791   :  { %1602 = vsyncpa [#allocation3 + $0x1], 1 }
 0x792   :  { %1603 = vsyncpa [#allocation4], 1 }
 0x793   :  { %1605 = vsyncpa [#allocation4 + $0x1], 1 }

</bundles_post_ra>
